<compile_context>
chip_gen: v7x
topology: tpu7x:2x2x1
jax: 0.10.0
libtpu: 0.0.40
codegen_flags: <defaults>
</compile_context>

<pallas_src>
import functools

import jax
import jax.numpy as jnp
from jax.experimental import pallas as pl
from jax.experimental.pallas import tpu as pltpu


def _layernorm(x, gamma, beta, eps=1e-5):
    mu = jnp.mean(x, axis=-1, keepdims=True)
    var = jnp.mean((x - mu) ** 2, axis=-1, keepdims=True)
    return (x - mu) * jax.lax.rsqrt(var + eps) * gamma + beta


def block_kernel(x_ref,
                 wqkv_ref, wo_ref, w1_ref, w2_ref,
                 vec_ref, b1_ref,
                 o_ref, *, b_tile, seq_len, num_heads, head_size):
    x = x_ref[...]                               # (R, C) f32, R = b_tile * T
    R, C = x.shape
    T, H, hs = seq_len, num_heads, head_size

    # packed (6, C) f32 vectors: ln1 g/b, ln2 g/b, attn-out bias, ffn-out bias
    g1, be1 = vec_ref[0:1, :], vec_ref[1:2, :]
    g2, be2 = vec_ref[2:3, :], vec_ref[3:4, :]
    bo, b2 = vec_ref[4:5, :], vec_ref[5:6, :]

    # ---- LayerNorm 1 + multi-head causal self-attention (heads batched) ----
    xn = _layernorm(x, g1, be1)

    # fused Q|K|V projection: one MXU pass with N = 3C; 1/sqrt(hs) pre-folded into Q cols
    qkv = jnp.dot(xn.astype(jnp.bfloat16), wqkv_ref[...],
                  preferred_element_type=jnp.float32)          # (R, 3C) f32
    q, k, v = qkv[:, :C], qkv[:, C:2 * C], qkv[:, 2 * C:]

    def split_heads(t):                          # (R, C) -> (b_tile*H, T, hs)
        t = t.reshape(b_tile, T, H, hs)
        t = jnp.swapaxes(t, 1, 2)                # (b_tile, H, T, hs)
        return t.reshape(b_tile * H, T, hs).astype(jnp.bfloat16)

    qh, kh, vh = split_heads(q), split_heads(k), split_heads(v)

    # causal mask applied directly on the scores (no materialized additive bias tensor)
    row = jax.lax.broadcasted_iota(jnp.int32, (T, T), 0)
    col = jax.lax.broadcasted_iota(jnp.int32, (T, T), 1)
    causal = (col <= row)[None, :, :]

    # batched attention over the (b_tile*H) leading dim — single MXU stream
    s = jnp.einsum('bqd,bkd->bqk', qh, kh,
                   preferred_element_type=jnp.float32)         # (bH, T, T) f32
    s = jnp.where(causal, s, -1e30)
    m = jnp.max(s, axis=-1, keepdims=True)
    p = jnp.exp(s - m)                                         # unnormalized probs
    denom = jnp.sum(p, axis=-1, keepdims=True)                 # (bH, T, 1)
    ctx = jnp.einsum('bqk,bkd->bqd', p.astype(jnp.bfloat16), vh,
                     preferred_element_type=jnp.float32)       # (bH, T, hs)
    ctx = ctx * pl.reciprocal(denom, approx=True)              # EUP, not VALU divide

    # merge heads back: (bH, T, hs) -> (R, C)
    ctx = ctx.reshape(b_tile, H, T, hs)
    ctx = jnp.swapaxes(ctx, 1, 2).reshape(R, C)

    attn = jnp.dot(ctx.astype(jnp.bfloat16), wo_ref[...],
                   preferred_element_type=jnp.float32) + bo
    x = x + attn                                               # residual 1

    # ---- LayerNorm 2 + feed-forward (C -> 4C -> C, ReLU) ----
    xn2 = _layernorm(x, g2, be2)
    h1 = jnp.dot(xn2.astype(jnp.bfloat16), w1_ref[...],
                 preferred_element_type=jnp.float32) + b1_ref[...]
    h1 = jnp.maximum(h1, 0.0)
    ff = jnp.dot(h1.astype(jnp.bfloat16), w2_ref[...],
                 preferred_element_type=jnp.float32) + b2
    o_ref[...] = x + ff                                        # residual 2


def prepare_params(params, *, num_heads):
    """ONE-TIME weight prep (call once, reuse across forwards — not per call):
    bf16 cast, QKV fusion, 1/sqrt(hs) folded into Q, tiny f32 vectors packed."""
    C = params["wq"].shape[0]
    hs = C // num_heads
    scale = hs ** -0.5
    wqkv = jnp.concatenate(
        [params["wq"] * scale, params["wk"], params["wv"]], axis=1
    ).astype(jnp.bfloat16)                                     # (C, 3C) bf16
    vec = jnp.concatenate(
        [params["g1"], params["be1"], params["g2"], params["be2"],
         params["bo"], params["b2"]], axis=0).astype(jnp.float32)   # (6, C) f32
    return {
        "wqkv": wqkv,
        "wo": params["wo"].astype(jnp.bfloat16),
        "w1": params["w1"].astype(jnp.bfloat16),
        "w2": params["w2"].astype(jnp.bfloat16),
        "vec": vec,
        "b1": params["b1"].astype(jnp.float32),                # (1, 4C) f32
    }


def _num_tensorcores():
    try:
        return max(1, int(getattr(jax.devices()[0], "num_cores", 1) or 1))
    except Exception:
        return 1


def _choose_b_tile(B, T, C, H, num_cores, budget_bytes=16 * 1024 * 1024):
    """Largest batch tile whose live f32 intermediates fit a VMEM budget,
    preferring >= num_cores grid steps so 2-TC chips (v7x) keep both cores busy
    while single-TC chips (v5e/v6e) get grid=1 (no per-step overhead)."""
    def live_bytes(bt):
        R = bt * T
        b = R * 4 * C * 4              # FFN hidden h1 (f32) — largest single buffer
        b += 12 * R * C * 4            # x/out blocks, residuals, q/k/v, ctx, ff, ...
        b += 2 * bt * H * T * T * 4    # scores + probs
        return b
    divisors = [d for d in range(1, B + 1) if B % d == 0]
    fitting = [d for d in divisors if live_bytes(d) <= budget_bytes]
    if not fitting:
        return 1
    parallel = [d for d in fitting if (B // d) >= num_cores]
    return max(parallel) if parallel else max(fitting)


def block_forward(x, prepared, *, num_heads, b_tile=None):
    B, T, C = x.shape
    head_size = C // num_heads

    if b_tile is None:
        b_tile = _choose_b_tile(B, T, C, num_heads, _num_tensorcores())
    assert B % b_tile == 0
    grid_b = B // b_tile
    R = b_tile * T
    assert grid_b == 1 or R % 8 == 0, "batch-tile rows must be sublane aligned"

    # lane-dense, sublane-aligned 2-D layout; reshape is wrapper-side metadata
    x2 = x.reshape(B * T, C)

    wqkv, wo, w1, w2 = prepared["wqkv"], prepared["wo"], prepared["w1"], prepared["w2"]
    vec, b1 = prepared["vec"], prepared["b1"]
    operands = [x2, wqkv, wo, w1, w2, vec, b1]

    def const_spec(a):
        # constant index_map -> fetched once and reused across all grid steps;
        # single-buffered (never changes) to halve resident weight VMEM (v7x 64 MiB)
        return pl.BlockSpec(a.shape, lambda i: (0,) * a.ndim,
                            pipeline_mode=pl.Buffered(1))

    in_specs = [pl.BlockSpec((R, C), lambda i: (i, 0))]
    in_specs += [const_spec(a) for a in operands[1:]]

    kernel = functools.partial(block_kernel, b_tile=b_tile, seq_len=T,
                               num_heads=num_heads, head_size=head_size)

    weight_bytes = sum(int(a.size) * a.dtype.itemsize for a in operands[1:])
    cost = pl.CostEstimate(
        flops=2 * B * T * 12 * C * C + 4 * B * T * T * C,
        transcendentals=B * num_heads * T * T,
        bytes_accessed=2 * int(x2.size) * 4 + weight_bytes,
    )

    out = pl.pallas_call(
        kernel,
        out_shape=jax.ShapeDtypeStruct((B * T, C), jnp.float32),
        grid=(grid_b,),
        in_specs=in_specs,
        out_specs=pl.BlockSpec((R, C), lambda i: (i, 0)),
        compiler_params=pltpu.CompilerParams(
            dimension_semantics=("parallel",),
            vmem_limit_bytes=64 * 1024 * 1024),
        cost_estimate=cost,
    )(*operands)
    return out.reshape(B, T, C)


def init_params(key, C):
    ks = jax.random.split(key, 8)
    s = 0.02
    return {
        # attention: per-head K/Q/V Linears (no bias) concatenated into (C, C)
        "wq": jax.random.normal(ks[0], (C, C), jnp.float32) * s,
        "wk": jax.random.normal(ks[1], (C, C), jnp.float32) * s,
        "wv": jax.random.normal(ks[2], (C, C), jnp.float32) * s,
        # output projection Linear(C, C)
        "wo": jax.random.normal(ks[3], (C, C), jnp.float32) * s,
        "bo": jax.random.normal(ks[4], (1, C), jnp.float32) * s,
        # feed-forward: Linear(C, 4C) -> ReLU -> Linear(4C, C)
        "w1": jax.random.normal(ks[5], (C, 4 * C), jnp.float32) * s,
        "b1": jax.random.normal(ks[6], (1, 4 * C), jnp.float32) * s,
        "w2": jax.random.normal(ks[7], (4 * C, C), jnp.float32) * s,
        "b2": jnp.zeros((1, C), jnp.float32),
        # LayerNorms (PyTorch default init: gamma=1, beta=0)
        "g1": jnp.ones((1, C), jnp.float32),
        "be1": jnp.zeros((1, C), jnp.float32),
        "g2": jnp.ones((1, C), jnp.float32),
        "be2": jnp.zeros((1, C), jnp.float32),
    }


if __name__ == "__main__":
    # embedding_features=128 (multiple of 128 lanes), num_heads=4, seq=16, batch=2
    B, T, C, NUM_HEADS = 2, 16, 128, 4
    key = jax.random.PRNGKey(0)
    kx, kp = jax.random.split(key)
    x = jax.random.normal(kx, (B, T, C), jnp.float32)
    params = init_params(kp, C)
    prepared = prepare_params(params, num_heads=NUM_HEADS)   # one-time weight prep

    out = block_forward(x, prepared, num_heads=NUM_HEADS)
    jax.block_until_ready(out)
    assert out.shape == (B, T, C) and out.dtype == jnp.float32
    print("KERNEL_OK")
</pallas_src>

<mosaic_0001>
module attributes {stable_mosaic.version = 11 : i64} {
  func.func @block_kernel(%arg0: i32, %arg1: memref<32x128xf32, #tpu.memory_space<vmem>>, %arg2: memref<128x384xbf16, #tpu.memory_space<vmem>>, %arg3: memref<128x128xbf16, #tpu.memory_space<vmem>>, %arg4: memref<128x512xbf16, #tpu.memory_space<vmem>>, %arg5: memref<512x128xbf16, #tpu.memory_space<vmem>>, %arg6: memref<6x128xf32, #tpu.memory_space<vmem>>, %arg7: memref<1x512xf32, #tpu.memory_space<vmem>>, %arg8: memref<32x128xf32, #tpu.memory_space<vmem>>) attributes {dimension_semantics = [#tpu.dimension_semantics<parallel>], iteration_bounds = array<i64: 1>, scalar_prefetch = 0 : i64, scratch_operands = 0 : i64, tpu.core_type = #tpu.core_type<tc>, window_params = [{transform_indices = @transform_0, window_bounds = array<i64: 32, 128>}, {pipeline_mode = #tpu.pipeline_mode<synchronous>, transform_indices = @transform_1, window_bounds = array<i64: 128, 384>}, {pipeline_mode = #tpu.pipeline_mode<synchronous>, transform_indices = @transform_2, window_bounds = array<i64: 128, 128>}, {pipeline_mode = #tpu.pipeline_mode<synchronous>, transform_indices = @transform_3, window_bounds = array<i64: 128, 512>}, {pipeline_mode = #tpu.pipeline_mode<synchronous>, transform_indices = @transform_4, window_bounds = array<i64: 512, 128>}, {pipeline_mode = #tpu.pipeline_mode<synchronous>, transform_indices = @transform_5, window_bounds = array<i64: 6, 128>}, {pipeline_mode = #tpu.pipeline_mode<synchronous>, transform_indices = @transform_6, window_bounds = array<i64: 1, 512>}, {transform_indices = @transform_7, window_bounds = array<i64: 32, 128>}]} {
    %c0 = arith.constant 0 : index
    %c0_0 = arith.constant 0 : index
    %0 = vector.load %arg1[%c0, %c0_0] : memref<32x128xf32, #tpu.memory_space<vmem>>, vector<32x128xf32>
    %c0_1 = arith.constant 0 : index
    %c0_2 = arith.constant 0 : index
    %1 = vector.load %arg6[%c0_1, %c0_2] : memref<6x128xf32, #tpu.memory_space<vmem>>, vector<1x128xf32>
    %c1 = arith.constant 1 : index
    %c0_3 = arith.constant 0 : index
    %2 = vector.load %arg6[%c1, %c0_3] : memref<6x128xf32, #tpu.memory_space<vmem>>, vector<1x128xf32>
    %c2 = arith.constant 2 : index
    %c0_4 = arith.constant 0 : index
    %3 = vector.load %arg6[%c2, %c0_4] : memref<6x128xf32, #tpu.memory_space<vmem>>, vector<1x128xf32>
    %c3 = arith.constant 3 : index
    %c0_5 = arith.constant 0 : index
    %4 = vector.load %arg6[%c3, %c0_5] : memref<6x128xf32, #tpu.memory_space<vmem>>, vector<1x128xf32>
    %c4 = arith.constant 4 : index
    %c0_6 = arith.constant 0 : index
    %5 = vector.load %arg6[%c4, %c0_6] : memref<6x128xf32, #tpu.memory_space<vmem>>, vector<1x128xf32>
    %c5 = arith.constant 5 : index
    %c0_7 = arith.constant 0 : index
    %6 = vector.load %arg6[%c5, %c0_7] : memref<6x128xf32, #tpu.memory_space<vmem>>, vector<1x128xf32>
    %cst = arith.constant dense<0.000000e+00> : vector<32xf32>
    %7 = vector.multi_reduction <add>, %0, %cst [1] : vector<32x128xf32> to vector<32xf32>
    %8 = vector.shape_cast %7 : vector<32xf32> to vector<32x1xf32>
    %cst_8 = arith.constant 1.280000e+02 : f32
    %9 = vector.broadcast %cst_8 : f32 to vector<32x1xf32>
    %10 = arith.divf %8, %9 : vector<32x1xf32>
    %11 = vector.broadcast %10 : vector<32x1xf32> to vector<32x128xf32>
    %12 = arith.subf %0, %11 : vector<32x128xf32>
    %13 = arith.mulf %12, %12 : vector<32x128xf32>
    %cst_9 = arith.constant dense<0.000000e+00> : vector<32xf32>
    %14 = vector.multi_reduction <add>, %13, %cst_9 [1] : vector<32x128xf32> to vector<32xf32>
    %15 = vector.shape_cast %14 : vector<32xf32> to vector<32x1xf32>
    %cst_10 = arith.constant 1.280000e+02 : f32
    %16 = vector.broadcast %cst_10 : f32 to vector<32x1xf32>
    %17 = arith.divf %15, %16 : vector<32x1xf32>
    %18 = vector.broadcast %10 : vector<32x1xf32> to vector<32x128xf32>
    %19 = arith.subf %0, %18 : vector<32x128xf32>
    %cst_11 = arith.constant 9.99999974E-6 : f32
    %20 = vector.broadcast %cst_11 : f32 to vector<32x1xf32>
    %21 = arith.addf %17, %20 : vector<32x1xf32>
    %22 = math.rsqrt %21 : vector<32x1xf32>
    %23 = vector.broadcast %22 : vector<32x1xf32> to vector<32x128xf32>
    %24 = arith.mulf %19, %23 : vector<32x128xf32>
    %25 = vector.broadcast %1 : vector<1x128xf32> to vector<32x128xf32>
    %26 = arith.mulf %24, %25 : vector<32x128xf32>
    %27 = vector.broadcast %2 : vector<1x128xf32> to vector<32x128xf32>
    %28 = arith.addf %26, %27 : vector<32x128xf32>
    %29 = arith.truncf %28 : vector<32x128xf32> to vector<32x128xbf16>
    %c0_12 = arith.constant 0 : index
    %c0_13 = arith.constant 0 : index
    %30 = vector.load %arg2[%c0_12, %c0_13] : memref<128x384xbf16, #tpu.memory_space<vmem>>, vector<128x384xbf16>
    %cst_14 = arith.constant dense<0.000000e+00> : vector<32x384xf32>
    %31 = tpu.matmul %29, %30, %cst_14 {dimension_numbers = #tpu.dot_dimension_numbers<[1], [0], [0], [1], [0, 0, 1, 1], [], []>} : vector<32x128xbf16>, vector<128x384xbf16>, vector<32x384xf32> -> vector<32x384xf32>
    %32 = vector.extract_strided_slice %31 {offsets = [0, 0], sizes = [32, 128], strides = [1, 1]} : vector<32x384xf32> to vector<32x128xf32>
    %33 = vector.extract_strided_slice %31 {offsets = [0, 128], sizes = [32, 128], strides = [1, 1]} : vector<32x384xf32> to vector<32x128xf32>
    %34 = vector.extract_strided_slice %31 {offsets = [0, 256], sizes = [32, 128], strides = [1, 1]} : vector<32x384xf32> to vector<32x128xf32>
    %35 = vector.shape_cast %32 : vector<32x128xf32> to vector<2x16x4x32xf32>
    %36 = tpu.transpose %35, [0, 2, 1, 3] : vector<2x16x4x32xf32> -> vector<2x4x16x32xf32>
    %37 = vector.shape_cast %36 : vector<2x4x16x32xf32> to vector<8x16x32xf32>
    %38 = arith.truncf %37 : vector<8x16x32xf32> to vector<8x16x32xbf16>
    %39 = vector.shape_cast %33 : vector<32x128xf32> to vector<2x16x4x32xf32>
    %40 = tpu.transpose %39, [0, 2, 1, 3] : vector<2x16x4x32xf32> -> vector<2x4x16x32xf32>
    %41 = vector.shape_cast %40 : vector<2x4x16x32xf32> to vector<8x16x32xf32>
    %42 = arith.truncf %41 : vector<8x16x32xf32> to vector<8x16x32xbf16>
    %43 = vector.shape_cast %34 : vector<32x128xf32> to vector<2x16x4x32xf32>
    %44 = tpu.transpose %43, [0, 2, 1, 3] : vector<2x16x4x32xf32> -> vector<2x4x16x32xf32>
    %45 = vector.shape_cast %44 : vector<2x4x16x32xf32> to vector<8x16x32xf32>
    %46 = arith.truncf %45 : vector<8x16x32xf32> to vector<8x16x32xbf16>
    %47 = tpu.iota {dimensions = array<i32: 0>} : vector<16x16xi32>
    %48 = tpu.iota {dimensions = array<i32: 1>} : vector<16x16xi32>
    %49 = arith.cmpi sle, %48, %47 : vector<16x16xi32>
    %50 = vector.shape_cast %49 : vector<16x16xi1> to vector<1x16x16xi1>
    "tpu.trace_start"() <{level = 10 : i32, message = "bqd,bkd->bqk"}> : () -> ()
    %cst_15 = arith.constant dense<0.000000e+00> : vector<8x16x16xf32>
    %51 = tpu.matmul %38, %42, %cst_15 {dimension_numbers = #tpu.dot_dimension_numbers<[2], [2], [1], [1], [0, 0, 0, 1, 1, 1], [0], [0]>} : vector<8x16x32xbf16>, vector<8x16x32xbf16>, vector<8x16x16xf32> -> vector<8x16x16xf32>
    %cst_16 = arith.constant -1.000000e+30 : f32
    "tpu.trace_stop"() : () -> ()
    %52 = vector.shape_cast %50 : vector<1x16x16xi1> to vector<1x16x16xi1>
    %53 = vector.broadcast %52 : vector<1x16x16xi1> to vector<8x16x16xi1>
    %54 = vector.broadcast %cst_16 : f32 to vector<8x16x16xf32>
    %55 = arith.select %53, %51, %54 : vector<8x16x16xi1>, vector<8x16x16xf32>
    %cst_17 = arith.constant dense<0xFF800000> : vector<8x16xf32>
    %56 = vector.multi_reduction <maximumf>, %55, %cst_17 [2] : vector<8x16x16xf32> to vector<8x16xf32>
    %57 = vector.shape_cast %56 : vector<8x16xf32> to vector<8x16x1xf32>
    %58 = vector.broadcast %57 : vector<8x16x1xf32> to vector<8x16x16xf32>
    %59 = arith.subf %55, %58 : vector<8x16x16xf32>
    %60 = math.exp %59 : vector<8x16x16xf32>
    %cst_18 = arith.constant dense<0.000000e+00> : vector<8x16xf32>
    %61 = vector.multi_reduction <add>, %60, %cst_18 [2] : vector<8x16x16xf32> to vector<8x16xf32>
    %62 = vector.shape_cast %61 : vector<8x16xf32> to vector<8x16x1xf32>
    %63 = arith.truncf %60 : vector<8x16x16xf32> to vector<8x16x16xbf16>
    "tpu.trace_start"() <{level = 10 : i32, message = "bqk,bkd->bqd"}> : () -> ()
    %cst_19 = arith.constant dense<0.000000e+00> : vector<8x16x32xf32>
    %64 = tpu.matmul %63, %46, %cst_19 {dimension_numbers = #tpu.dot_dimension_numbers<[2], [1], [1], [2], [0, 0, 0, 1, 1, 2], [0], [0]>} : vector<8x16x16xbf16>, vector<8x16x32xbf16>, vector<8x16x32xf32> -> vector<8x16x32xf32>
    "tpu.trace_stop"() : () -> ()
    %65 = tpu.reciprocal %62 {approx = true} : vector<8x16x1xf32> -> vector<8x16x1xf32>
    %66 = vector.broadcast %65 : vector<8x16x1xf32> to vector<8x16x32xf32>
    %67 = arith.mulf %64, %66 : vector<8x16x32xf32>
    %68 = vector.shape_cast %67 : vector<8x16x32xf32> to vector<2x4x16x32xf32>
    %69 = tpu.transpose %68, [0, 2, 1, 3] : vector<2x4x16x32xf32> -> vector<2x16x4x32xf32>
    %70 = vector.shape_cast %69 : vector<2x16x4x32xf32> to vector<32x128xf32>
    %71 = arith.truncf %70 : vector<32x128xf32> to vector<32x128xbf16>
    %c0_20 = arith.constant 0 : index
    %c0_21 = arith.constant 0 : index
    %72 = vector.load %arg3[%c0_20, %c0_21] : memref<128x128xbf16, #tpu.memory_space<vmem>>, vector<128x128xbf16>
    %cst_22 = arith.constant dense<0.000000e+00> : vector<32x128xf32>
    %73 = tpu.matmul %71, %72, %cst_22 {dimension_numbers = #tpu.dot_dimension_numbers<[1], [0], [0], [1], [0, 0, 1, 1], [], []>} : vector<32x128xbf16>, vector<128x128xbf16>, vector<32x128xf32> -> vector<32x128xf32>
    %74 = vector.broadcast %5 : vector<1x128xf32> to vector<32x128xf32>
    %75 = arith.addf %73, %74 : vector<32x128xf32>
    %76 = arith.addf %0, %75 : vector<32x128xf32>
    %cst_23 = arith.constant dense<0.000000e+00> : vector<32xf32>
    %77 = vector.multi_reduction <add>, %76, %cst_23 [1] : vector<32x128xf32> to vector<32xf32>
    %78 = vector.shape_cast %77 : vector<32xf32> to vector<32x1xf32>
    %cst_24 = arith.constant 1.280000e+02 : f32
    %79 = vector.broadcast %cst_24 : f32 to vector<32x1xf32>
    %80 = arith.divf %78, %79 : vector<32x1xf32>
    %81 = vector.broadcast %80 : vector<32x1xf32> to vector<32x128xf32>
    %82 = arith.subf %76, %81 : vector<32x128xf32>
    %83 = arith.mulf %82, %82 : vector<32x128xf32>
    %cst_25 = arith.constant dense<0.000000e+00> : vector<32xf32>
    %84 = vector.multi_reduction <add>, %83, %cst_25 [1] : vector<32x128xf32> to vector<32xf32>
    %85 = vector.shape_cast %84 : vector<32xf32> to vector<32x1xf32>
    %cst_26 = arith.constant 1.280000e+02 : f32
    %86 = vector.broadcast %cst_26 : f32 to vector<32x1xf32>
    %87 = arith.divf %85, %86 : vector<32x1xf32>
    %88 = vector.broadcast %80 : vector<32x1xf32> to vector<32x128xf32>
    %89 = arith.subf %76, %88 : vector<32x128xf32>
    %cst_27 = arith.constant 9.99999974E-6 : f32
    %90 = vector.broadcast %cst_27 : f32 to vector<32x1xf32>
    %91 = arith.addf %87, %90 : vector<32x1xf32>
    %92 = math.rsqrt %91 : vector<32x1xf32>
    %93 = vector.broadcast %92 : vector<32x1xf32> to vector<32x128xf32>
    %94 = arith.mulf %89, %93 : vector<32x128xf32>
    %95 = vector.broadcast %3 : vector<1x128xf32> to vector<32x128xf32>
    %96 = arith.mulf %94, %95 : vector<32x128xf32>
    %97 = vector.broadcast %4 : vector<1x128xf32> to vector<32x128xf32>
    %98 = arith.addf %96, %97 : vector<32x128xf32>
    %99 = arith.truncf %98 : vector<32x128xf32> to vector<32x128xbf16>
    %c0_28 = arith.constant 0 : index
    %c0_29 = arith.constant 0 : index
    %100 = vector.load %arg4[%c0_28, %c0_29] : memref<128x512xbf16, #tpu.memory_space<vmem>>, vector<128x512xbf16>
    %cst_30 = arith.constant dense<0.000000e+00> : vector<32x512xf32>
    %101 = tpu.matmul %99, %100, %cst_30 {dimension_numbers = #tpu.dot_dimension_numbers<[1], [0], [0], [1], [0, 0, 1, 1], [], []>} : vector<32x128xbf16>, vector<128x512xbf16>, vector<32x512xf32> -> vector<32x512xf32>
    %c0_31 = arith.constant 0 : index
    %c0_32 = arith.constant 0 : index
    %102 = vector.load %arg7[%c0_31, %c0_32] : memref<1x512xf32, #tpu.memory_space<vmem>>, vector<1x512xf32>
    %103 = vector.broadcast %102 : vector<1x512xf32> to vector<32x512xf32>
    %104 = arith.addf %101, %103 : vector<32x512xf32>
    %cst_33 = arith.constant 0.000000e+00 : f32
    %105 = vector.broadcast %cst_33 : f32 to vector<32x512xf32>
    %106 = arith.maximumf %104, %105 : vector<32x512xf32>
    %107 = arith.truncf %106 : vector<32x512xf32> to vector<32x512xbf16>
    %c0_34 = arith.constant 0 : index
    %c0_35 = arith.constant 0 : index
    %108 = vector.load %arg5[%c0_34, %c0_35] : memref<512x128xbf16, #tpu.memory_space<vmem>>, vector<512x128xbf16>
    %cst_36 = arith.constant dense<0.000000e+00> : vector<32x128xf32>
    %109 = tpu.matmul %107, %108, %cst_36 {dimension_numbers = #tpu.dot_dimension_numbers<[1], [0], [0], [1], [0, 0, 1, 1], [], []>} : vector<32x512xbf16>, vector<512x128xbf16>, vector<32x128xf32> -> vector<32x128xf32>
    %110 = vector.broadcast %6 : vector<1x128xf32> to vector<32x128xf32>
    %111 = arith.addf %109, %110 : vector<32x128xf32>
    %112 = arith.addf %76, %111 : vector<32x128xf32>
    %c0_37 = arith.constant 0 : index
    %c0_38 = arith.constant 0 : index
    %113 = vector.load %arg8[%c0_37, %c0_38] : memref<32x128xf32, #tpu.memory_space<vmem>>, vector<32x128xf32>
    tpu.vector_store %arg8[%c0_37, %c0_38], %112 {strides = array<i32>} : memref<32x128xf32, #tpu.memory_space<vmem>>, vector<32x128xf32>,
    return
  }
  func.func @transform_0(%arg0: i32) -> (i32, i32) {
    %c0_i32 = arith.constant 0 : i32
    %c0_i32_0 = arith.constant 0 : i32
    return %arg0, %c0_i32 : i32, i32
  }
  func.func @transform_1(%arg0: i32) -> (i32, i32) {
    %c0_i32 = arith.constant 0 : i32
    %c0_i32_0 = arith.constant 0 : i32
    %c0_i32_1 = arith.constant 0 : i32
    return %c0_i32, %c0_i32_0 : i32, i32
  }
  func.func @transform_2(%arg0: i32) -> (i32, i32) {
    %c0_i32 = arith.constant 0 : i32
    %c0_i32_0 = arith.constant 0 : i32
    %c0_i32_1 = arith.constant 0 : i32
    return %c0_i32, %c0_i32_0 : i32, i32
  }
  func.func @transform_3(%arg0: i32) -> (i32, i32) {
    %c0_i32 = arith.constant 0 : i32
    %c0_i32_0 = arith.constant 0 : i32
    %c0_i32_1 = arith.constant 0 : i32
    return %c0_i32, %c0_i32_0 : i32, i32
  }
  func.func @transform_4(%arg0: i32) -> (i32, i32) {
    %c0_i32 = arith.constant 0 : i32
    %c0_i32_0 = arith.constant 0 : i32
    %c0_i32_1 = arith.constant 0 : i32
    return %c0_i32, %c0_i32_0 : i32, i32
  }
  func.func @transform_5(%arg0: i32) -> (i32, i32) {
    %c0_i32 = arith.constant 0 : i32
    %c0_i32_0 = arith.constant 0 : i32
    %c0_i32_1 = arith.constant 0 : i32
    return %c0_i32, %c0_i32_0 : i32, i32
  }
  func.func @transform_6(%arg0: i32) -> (i32, i32) {
    %c0_i32 = arith.constant 0 : i32
    %c0_i32_0 = arith.constant 0 : i32
    %c0_i32_1 = arith.constant 0 : i32
    return %c0_i32, %c0_i32_0 : i32, i32
  }
  func.func @transform_7(%arg0: i32) -> (i32, i32) {
    %c0_i32 = arith.constant 0 : i32
    %c0_i32_0 = arith.constant 0 : i32
    return %arg0, %c0_i32 : i32, i32
  }
}

</mosaic_0001>

<bundles_post_ra>
// kernel: tpu_custom_call.1
= control target key start
LH: loop header
LB: loop body
LE: loop exit
PB: predicated region body
PF: predicated region fallthrough
CT: control target
= control target key end

     0   :  { %12 = vsyncpa [#allocation3], 0  ;;  %s6761_s0 = inlined_call_operand.hbm [shape: f32[32,128], index: 0, kind: input, shape index: {}]   ;;  %s6762_s1 = inlined_call_operand.hbm [shape: bf16[128,384], index: 1, kind: input, shape index: {}]   ;;  %s6763_s2 = inlined_call_operand.hbm [shape: bf16[128,128], index: 2, kind: input, shape index: {}]   ;;  %s6764_s3 = inlined_call_operand.hbm [shape: bf16[128,512], index: 3, kind: input, shape index: {}]   ;;  %s6765_s4 = inlined_call_operand.hbm [shape: bf16[512,128], index: 4, kind: input, shape index: {}]   ;;  %s6766_s5 = inlined_call_operand.hbm [shape: f32[6,128], index: 5, kind: input, shape index: {}]   ;;  %s6767_s6 = inlined_call_operand.hbm [shape: f32[1,512], index: 6, kind: input, shape index: {}]   ;;  %s6768_s7 = inlined_call_operand.hbm [shape: f32[32,128], index: 7, kind: output, shape index: {}]  }
   0x1   :  { %13 = vsyncpa [#allocation6], 0 }
   0x2   :  { %14 = vsyncpa [#allocation9], 0 }
   0x3   :  { %15 = vsyncpa [#allocation12], 0 }
   0x4   :  { %16 = vsyncpa [#allocation4], 0  ;;  %s5529_s24 = smov [#allocation5]   ;;  %s5343_s28 = scalar_lea.hbm %s6762_s1, 3072 }
   0x5   :  { %s34_s25 = sshll.u32 %s5529_s24, 4  ;;  %p5344_p0 = scmp.ne.s32.totalorder %s6762_s1, %s5343_s28  ;;  %s35_s25 = int_to_ptr.vmem [resolvable:$true] %s34_s25 }
   0x6   :  { %p5347_p1 = scmp.lt.u32.totalorder %s5343_s28, %s6762_s1 }
   0x8   :  { %p5349_p2 = pnand %p5347_p1, %p5344_p0 }
   0xa   :  { %5352 = shalt.err (!%p5349_p2)
}
   0xb   :  { %s5353_s10 = scalar_lea.vmem %s35_s25, 3072  ;;  %p5358_p4 = scmp.lt.s32.totalorder %s35_s25, %s35_s25 }
   0xc   :  { %p5354_p3 = scmp.ne.s32.totalorder %s35_s25, %s5353_s10  ;;  %p5359_p5 = scmp.lt.s32.totalorder %s5353_s10, %s5353_s10 }
   0xe   :  { %p5360_p6 = por %p5359_p5, %p5358_p4 }
  0x10   :  { %p5361_p7 = pnand %p5360_p6, %p5354_p3 }
  0x12   :  { %5364 = shalt.err (!%p5361_p7)
}
  0x13   :  { %s5530_s11 = smov 192   ;;  %s5531_s12 = smov 12  }
  0x14   :  { %40 = dma.hbm_to_vmem [thread:$0]  %s6762_s1, 3072, %s35_s25, [#allocation6], %s5530_s11, %s5530_s11, %s5531_s12  }
  0x15   :  { %s5532_s15 = smov [#allocation8]   ;;  %s5365_s19 = scalar_lea.hbm %s6764_s3, 4096 }
  0x16   :  { %s58_s16 = sshll.u32 %s5532_s15, 4  ;;  %p5366_p8 = scmp.ne.s32.totalorder %s6764_s3, %s5365_s19  ;;  %s59_s16 = int_to_ptr.vmem [resolvable:$true] %s58_s16 }
  0x17   :  { %p5369_p9 = scmp.lt.u32.totalorder %s5365_s19, %s6764_s3 }
  0x19   :  { %p5371_p10 = pnand %p5369_p9, %p5366_p8 }
  0x1b   :  { %5374 = shalt.err (!%p5371_p10)
}
  0x1c   :  { %s5375_s24 = scalar_lea.vmem %s59_s16, 4096  ;;  %p5380_p12 = scmp.lt.s32.totalorder %s59_s16, %s59_s16 }
  0x1d   :  { %p5376_p11 = scmp.ne.s32.totalorder %s59_s16, %s5375_s24  ;;  %p5381_p13 = scmp.lt.s32.totalorder %s5375_s24, %s5375_s24 }
  0x1f   :  { %p5382_p0 = por %p5381_p13, %p5380_p12 }
  0x21   :  { %p5383_p1 = pnand %p5382_p0, %p5376_p11 }
  0x23   :  { %5386 = shalt.err (!%p5383_p1)
}
  0x24   :  { %s5533_s1 = smov 256   ;;  %s5534_s25 = smov 16  }
  0x25   :  { %64 = dma.hbm_to_vmem [thread:$0]  %s6764_s3, 4096, %s59_s16, [#allocation9], %s5533_s1, %s5533_s1, %s5534_s25  }
  0x26   :  { %s5535_s28 = smov [#allocation11]   ;;  %s5536_s30 = smov [#allocation2]  }
  0x27   :  { %s83_s29 = sshll.u32 %s5535_s28, 4  ;;  %s22_s8 = sshll.u32 %s5536_s30, 4  ;;  %s84_s29 = int_to_ptr.vmem [resolvable:$true] %s83_s29  ;;  %s5616_s8 = int_to_ptr.vmem [resolvable:$true] %s22_s8 }
  0x28   :  { %s5387_s11 = scalar_lea.hbm %s6766_s5, 128 }
  0x29   :  { %p5388_p2 = scmp.ne.s32.totalorder %s6766_s5, %s5387_s11  ;;  %p5391_p3 = scmp.lt.u32.totalorder %s5387_s11, %s6766_s5 }
  0x2b   :  { %p5393_p4 = pnand %p5391_p3, %p5388_p2 }
  0x2d   :  { %5396 = shalt.err (!%p5393_p4)
}
  0x2e   :  { %s5397_s3 = scalar_lea.vmem %s84_s29, 128  ;;  %p5402_p6 = scmp.lt.s32.totalorder %s84_s29, %s84_s29 }
  0x2f   :  { %p5398_p5 = scmp.ne.s32.totalorder %s84_s29, %s5397_s3  ;;  %p5403_p7 = scmp.lt.s32.totalorder %s5397_s3, %s5397_s3 }
  0x31   :  { %p5404_p8 = por %p5403_p7, %p5402_p6 }
  0x33   :  { %p5405_p9 = pnand %p5404_p8, %p5398_p5 }
  0x35   :  { %5408 = shalt.err (!%p5405_p9)
}
  0x36   :  { %86 = dma.hbm_to_vmem [thread:$0]  %s6766_s5, 128, %s84_s29, [#allocation12]  }
  0x37   :  { %s5409_s20 = scalar_lea.hbm %s6761_s0, 512 }
  0x38   :  { %p5410_p10 = scmp.ne.s32.totalorder %s6761_s0, %s5409_s20  ;;  %p5413_p11 = scmp.lt.u32.totalorder %s5409_s20, %s6761_s0 }
  0x3a   :  { %p5415_p12 = pnand %p5413_p11, %p5410_p10 }
  0x3c   :  { %5418 = shalt.err (!%p5415_p12)
}
  0x3d   :  { %s5419_s1 = scalar_lea.vmem %s5616_s8, 512  ;;  %p5424_p0 = scmp.lt.s32.totalorder %s5616_s8, %s5616_s8 }
  0x3e   :  { %p5420_p13 = scmp.ne.s32.totalorder %s5616_s8, %s5419_s1  ;;  %p5425_p1 = scmp.lt.s32.totalorder %s5419_s1, %s5419_s1 }
  0x40   :  { %p5426_p2 = por %p5425_p1, %p5424_p0 }
  0x42   :  { %p5427_p3 = pnand %p5426_p2, %p5420_p13 }
  0x44   :  { %5430 = shalt.err (!%p5427_p3)
}
  0x45   :  { %s5537_s5 = smov 128   ;;  %s5538_s25 = smov 8  }
  0x46   :  { %28 = dma.hbm_to_vmem [thread:$0]  %s6761_s0, 512, %s5616_s8, [#allocation3], %s5537_s5, %s5537_s5, %s5538_s25  }
  0x47   :  { %s5539_s28 = smov [#allocation7]   ;;  %s5431_s10 = scalar_lea.hbm %s6763_s2, 1024 }
  0x48   :  { %s46_s29 = sshll.u32 %s5539_s28, 4  ;;  %p5432_p4 = scmp.ne.s32.totalorder %s6763_s2, %s5431_s10  ;;  %s47_s29 = int_to_ptr.vmem [resolvable:$true] %s46_s29 }
  0x49   :  { %p5435_p5 = scmp.lt.u32.totalorder %s5431_s10, %s6763_s2 }
  0x4b   :  { %p5437_p6 = pnand %p5435_p5, %p5432_p4 }
  0x4d   :  { %5440 = shalt.err (!%p5437_p6)
}
  0x4e   :  { %s5441_s15 = scalar_lea.vmem %s47_s29, 1024  ;;  %p5446_p8 = scmp.lt.s32.totalorder %s47_s29, %s47_s29 }
  0x4f   :  { %p5442_p7 = scmp.ne.s32.totalorder %s47_s29, %s5441_s15  ;;  %p5447_p9 = scmp.lt.s32.totalorder %s5441_s15, %s5441_s15 }
  0x51   :  { %p5448_p10 = por %p5447_p9, %p5446_p8 }
  0x53   :  { %p5449_p11 = pnand %p5448_p10, %p5442_p7 }
  0x55   :  { %5452 = shalt.err (!%p5449_p11)
}
  0x56   :  { %s5540_s0 = smov 64   ;;  %s5541_s8 = smov 4  }
  0x57   :  { %52 = dma.hbm_to_vmem [thread:$0]  %s6763_s2, 1024, %s47_s29, [#allocation6], %s5540_s0, %s5540_s0, %s5541_s8  }
  0x58   :  { %s5542_s17 = smov [#allocation10]   ;;  %s5543_s19 = smov [#allocation13]  }
  0x59   :  { %s70_s18 = sshll.u32 %s5542_s17, 4  ;;  %s93_s20 = sshll.u32 %s5543_s19, 4  ;;  %s71_s18 = int_to_ptr.vmem [resolvable:$true] %s70_s18  ;;  %s94_s20 = int_to_ptr.vmem [resolvable:$true] %s93_s20 }
  0x5a   :  { %s5453_s23 = scalar_lea.hbm %s6765_s4, 4096 }
  0x5b   :  { %p5454_p12 = scmp.ne.s32.totalorder %s6765_s4, %s5453_s23  ;;  %p5457_p13 = scmp.lt.u32.totalorder %s5453_s23, %s6765_s4 }
  0x5d   :  { %p5459_p0 = pnand %p5457_p13, %p5454_p12 }
  0x5f   :  { %5462 = shalt.err (!%p5459_p0)
}
  0x60   :  { %s5463_s2 = scalar_lea.vmem %s71_s18, 4096  ;;  %p5468_p2 = scmp.lt.s32.totalorder %s71_s18, %s71_s18 }
  0x61   :  { %p5464_p1 = scmp.ne.s32.totalorder %s71_s18, %s5463_s2  ;;  %p5469_p3 = scmp.lt.s32.totalorder %s5463_s2, %s5463_s2 }
  0x63   :  { %p5470_p4 = por %p5469_p3, %p5468_p2 }
  0x65   :  { %p5471_p5 = pnand %p5470_p4, %p5464_p1 }
  0x67   :  { %5474 = shalt.err (!%p5471_p5)
}
  0x68   :  { %76 = dma.hbm_to_vmem [thread:$0]  %s6765_s4, 4096, %s71_s18, [#allocation9], %s5540_s0, %s5540_s0, %s5541_s8  }
  0x69   :  { %s5475_s10 = scalar_lea.hbm %s6767_s6, 64 }
  0x6a   :  { %p5476_p6 = scmp.ne.s32.totalorder %s6767_s6, %s5475_s10  ;;  %p5479_p7 = scmp.lt.u32.totalorder %s5475_s10, %s6767_s6 }
  0x6c   :  { %p5481_p8 = pnand %p5479_p7, %p5476_p6 }
  0x6e   :  { %5484 = shalt.err (!%p5481_p8)
}
  0x6f   :  { %s5485_s15 = scalar_lea.vmem %s94_s20, 64  ;;  %p5490_p10 = scmp.lt.s32.totalorder %s94_s20, %s94_s20 }
  0x70   :  { %p5486_p9 = scmp.ne.s32.totalorder %s94_s20, %s5485_s15  ;;  %p5491_p11 = scmp.lt.s32.totalorder %s5485_s15, %s5485_s15 }
  0x72   :  { %p5492_p12 = por %p5491_p11, %p5490_p10 }
  0x74   :  { %p5493_p13 = pnand %p5492_p12, %p5486_p9 }
  0x76   :  { %5496 = shalt.err (!%p5493_p13)
}
  0x77   :  { %96 = dma.hbm_to_vmem [thread:$0]  %s6767_s6, 64, %s94_s20, [#allocation12]  }
  0x78   :  { %5519 = dma.done.wait [#allocation3], 512  }
  0x79   :  { %5520 = vsyncadd [#allocation3], 4294966784 }
  0x7a   :  { %5521 = dma.done.wait [#allocation6], 4096  }
  0x7b   :  { %5522 = vsyncadd [#allocation6], 4294963200 }
  0x7c   :  { %5523 = dma.done.wait [#allocation9], 8192  }
  0x7d   :  { %5524 = vsyncadd [#allocation9], 4294959104 }
  0x7e   :  { %5525 = dma.done.wait [#allocation12], 192  }
  0x7f   :  { %5526 = vsyncadd [#allocation12], 4294967104  ;;  %v119_v0 = vld [vmem:[#allocation2] sm:$0xff]  ;;  %v121_v1 = vld [vmem:[#allocation2 + $0x10] sm:$0xff]  ;;  %v5544_v39 = vmov 0   ;;  %s5545_s6 = smov 96  }
  0x80   :  { %v120_v2 = vld [vmem:[#allocation2 + $0x8] sm:$0xff]  ;;  %129 = vadd.xlane.f32.xlu0 %v119_v0  ;;  %133 = vadd.xlane.f32.xlu1 %v121_v1  ;;  %v122_v3 = vld [vmem:[#allocation2 + $0x18] sm:$0xff]  ;;  %v5139_v4 = vld [vmem:[#allocation5 + $0x4] ss:$12 sps:$4 sm:$0xff]   ;;  %s5546_s3 = smov 32   ;;  %vm5548_vm0 = vmmov 0  }
  0x81   :  { %v5141_v5 = vld [vmem:[#allocation5] ss:$12 sps:$4 sm:$0xff]   ;;  %v5142_v6 = vld [vmem:[#allocation5 + $0x1c] ss:$12 sps:$4 sm:$0xff]   ;;  %352 = vmatprep.subr.bf16.mxu0 %v5139_v4  ;;  %v5145_v24 = vld [vmem:[#allocation5 + $0x18] ss:$12 sps:$4 sm:$0xff]   ;;  %384 = vmatprep.mubr.bf16.mxu0 %v5544_v39 }
  0x82   :  { %v5144_v7 = vld [vmem:[#allocation5 + $0x8] ss:$12 sps:$4 sm:$0xff]   ;;  %353 = vmatpush1.bf16.msra.mxu0 %v5141_v5  ;;  %v5148_v26 = vld [vmem:[#allocation5 + $0x20] ss:$12 sps:$4 sm:$0xff]   ;;  %v5149_v27 = vld [vmem:[#allocation5 + $0x30] ss:$12 sps:$4 sm:$0xff]  }
  0x83   :  { %4950 = vmatprep.subr.bf16.mxu1 %v5144_v7  ;;  %354 = vmatprep.subr.bf16.mxu0 %v5142_v6  ;;  %v5146_v25 = vld [vmem:[#allocation5 + $0x34] ss:$12 sps:$4 sm:$0xff]   ;;  %v5150_v28 = vld [vmem:[#allocation5 + $0x4c] ss:$12 sps:$4 sm:$0xff]   ;;  %v5154_v31 = vld [vmem:[#allocation5 + $0x64] ss:$12 sps:$4 sm:$0xff]  }
  0x84   :  { %131 = vadd.xlane.f32.xlu0 %v120_v2  ;;  %135 = vadd.xlane.f32.xlu1 %v122_v3  ;;  %v5152_v29 = vld [vmem:[#allocation5 + $0x38] ss:$12 sps:$4 sm:$0xff]   ;;  %v5153_v30 = vld [vmem:[#allocation5 + $0x48] ss:$12 sps:$4 sm:$0xff]   ;;  %v5156_v32 = vld [vmem:[#allocation5 + $0x50] ss:$12 sps:$4 sm:$0xff]  }
  0x85   :  { %4951 = vmatpush3.bf16.msra.mxu1 %v5144_v7  ;;  %v5157_v33 = vld [vmem:[#allocation5 + $0x60] ss:$12 sps:$4 sm:$0xff]   ;;  %v5158_v34 = vld [vmem:[#allocation5 + $0x7c] ss:$12 sps:$4 sm:$0xff]   ;;  %v5161_v36 = vld [vmem:[#allocation5 + $0x78] ss:$12 sps:$4 sm:$0xff]  }
  0x86   :  { %355 = vmatpush1.bf16.msra.mxu0 %v5145_v24  ;;  %4952 = vmatprep.subr.bf16.mxu1 %v5148_v26  ;;  %v5160_v35 = vld [vmem:[#allocation5 + $0x68] ss:$12 sps:$4 sm:$0xff]   ;;  %v5164_v38 = vld [vmem:[#allocation5 + $0x80] ss:$12 sps:$4 sm:$0xff]   ;;  %v5165_v40 = vld [vmem:[#allocation5 + $0x90] ss:$12 sps:$4 sm:$0xff]  }
  0x87   :  { %356 = vmatprep.subr.bf16.mxu0 %v5146_v25  ;;  %v5162_v37 = vld [vmem:[#allocation5 + $0x94] ss:$12 sps:$4 sm:$0xff]   ;;  %v5166_v41 = vld [vmem:[#allocation5 + $0xac] ss:$12 sps:$4 sm:$0xff]   ;;  %v5170_v44 = vld [vmem:[#allocation5 + $0xb0] ss:$12 sps:$4 sm:$0xff]  }
  0x88   :  { %v5168_v42 = vld [vmem:[#allocation5 + $0x98] ss:$12 sps:$4 sm:$0xff]   ;;  %v5169_v43 = vld [vmem:[#allocation5 + $0xa8] ss:$12 sps:$4 sm:$0xff]   ;;  %v4692_v59 = vld [vmem:[#allocation11] ss:$0 sm:$0xff] }
  0x89   :  { %4953 = vmatpush3.bf16.msra.mxu1 %v5148_v26  ;;  %v5547_v25 = vmov 0.0   ;;  %v5549_v26 = vmov 1983009808   ;;  %vm2237_vm1 = vcmask 261120   ;;  %vm2634_vm3 = vcmask 130048  }
  0x8a   :  { %357 = vmatpush1.bf16.msra.mxu0 %v5149_v27  ;;  %4954 = vmatprep.subr.bf16.mxu1 %v5152_v29  ;;  %v497_v27 = vunpack.c.l.s4 %v5549_v26  ;;  %vm3767_vm5 = vcmask 523264   ;;  %vm3772_vm6 = vcmask 785408  }
  0x8b   :  { %358 = vmatprep.subr.bf16.mxu0 %v5150_v28  ;;  %v499_v28 = vlaneseq }
  0x8d   :  { %4955 = vmatpush3.bf16.msra.mxu1 %v5152_v29 }
  0x8e   :  { %359 = vmatpush1.bf16.msra.mxu0 %v5153_v30  ;;  %4956 = vmatprep.subr.bf16.mxu1 %v5156_v32 }
  0x8f   :  { %360 = vmatprep.subr.bf16.mxu0 %v5154_v31  ;;  %v498_v31 = vunpack.c.0.s8 %v497_v27 }
  0x91   :  { %4957 = vmatpush3.bf16.msra.mxu1 %v5156_v32  ;;  %v5813_v32 = vshrl.u32 %v499_v28, 7 }
  0x92   :  { %361 = vmatpush1.bf16.msra.mxu0 %v5157_v33  ;;  %4958 = vmatprep.subr.bf16.mxu1 %v5160_v35 }
  0x93   :  { %362 = vmatprep.subr.bf16.mxu0 %v5158_v34  ;;  %v5550_v34 = vmov 1934713408  }
  0x95   :  { %4959 = vmatpush3.bf16.msra.mxu1 %v5160_v35  ;;  %v529_v35 = vunpack.c.l.s4 %v5550_v34 }
  0x96   :  { %363 = vmatpush1.bf16.msra.mxu0 %v5161_v36  ;;  %4960 = vmatprep.subr.bf16.mxu1 %v5164_v38 }
  0x97   :  { %364 = vmatprep.subr.bf16.mxu0 %v5162_v37  ;;  %v5818_v37 = vsub.s32 %v498_v31, %v5813_v32 }
  0x99   :  { %4961 = vmatpush3.bf16.msra.mxu1 %v5164_v38 }
  0x9a   :  { %365 = vmatpush1.bf16.msra.mxu0 %v5165_v40  ;;  %4962 = vmatprep.subr.bf16.mxu1 %v5168_v42 }
  0x9b   :  { %366 = vmatprep.subr.bf16.mxu0 %v5166_v41  ;;  %v530_v41 = vunpack.c.0.s8 %v529_v35 }
  0x9d   :  { %4963 = vmatpush3.bf16.msra.mxu1 %v5168_v42 }
  0x9e   :  { %367 = vmatpush1.bf16.msra.mxu0 %v5169_v43  ;;  %4964 = vmatprep.subr.bf16.mxu1 %v5170_v44 }
  0x9f   :  { %4970 = vmatprep.subr.bf16.mxu0 %v5547_v25 }
  0xa1   :  { %4965 = vmatpush3.bf16.msra.mxu1 %v5170_v44 }
  0xa2   :  { %4982 = vmatprep.subr.bf16.mxu1 %v5547_v25 }
 0x10d   :  { %v130_v8 = vpop.xlane.xlu0 %129  ;;  %v134_v9 = vpop.xlane.xlu1 %133 }
 0x10e   :  { %v138_v10 = vmul.f32 0.0078125, %v130_v8  ;;  %v140_v11 = vmul.f32 0.0078125, %v134_v9 }
 0x110   :  { %v5690_v12 = vsub.f32 %v119_v0, %v138_v10  ;;  %v5692_v13 = vsub.f32 %v121_v1, %v140_v11  ;;  %v4693_v0 = vld [vmem:[#allocation11 + $0x1] ss:$0 sm:$0xff] }
 0x111   :  { %v132_v14 = vpop.xlane.xlu0 %131  ;;  %v136_v15 = vpop.xlane.xlu1 %135 }
 0x112   :  { %v139_v16 = vmul.f32 0.0078125, %v132_v14  ;;  %v146_v17 = vmul.f32 %v5690_v12, %v5690_v12  ;;  %v141_v18 = vmul.f32 0.0078125, %v136_v15  ;;  %v148_v21 = vmul.f32 %v5692_v13, %v5692_v13 }
 0x114   :  { %v5696_v19 = vsub.f32 %v120_v2, %v139_v16  ;;  %150 = vadd.xlane.f32.xlu0 %v146_v17  ;;  %v5698_v20 = vsub.f32 %v122_v3, %v141_v18 }
 0x116   :  { %v147_v22 = vmul.f32 %v5696_v19, %v5696_v19  ;;  %v149_v23 = vmul.f32 %v5698_v20, %v5698_v20 }
 0x118   :  { %154 = vadd.xlane.f32.xlu0 %v148_v21  ;;  %152 = vadd.xlane.f32.xlu1 %v147_v22 }
 0x11c   :  { %156 = vadd.xlane.f32.xlu1 %v149_v23 }
 0x1a1   :  { %v151_v45 = vpop.xlane.xlu0 %150 }
 0x1a2   :  { %v158_v46 = vmul.f32 0.0078125, %v151_v45 }
 0x1a4   :  { %v162_v47 = vadd.f32 1e-05, %v158_v46 }
 0x1a5   :  { %v153_v48 = vpop.xlane.xlu1 %152  ;;  %v155_v49 = vpop.xlane.xlu0 %154 }
 0x1a6   :  { %5259 = vrsqrt.f32 %v162_v47  ;;  %v159_v50 = vmul.f32 0.0078125, %v153_v48  ;;  %v160_v51 = vmul.f32 0.0078125, %v155_v49 }
 0x1a8   :  { %v163_v52 = vadd.f32 1e-05, %v159_v50  ;;  %v164_v53 = vadd.f32 1e-05, %v160_v51  ;;  %v5827_v50 = vsub.s32 %v530_v41, %v5813_v32 }
 0x1a9   :  { %v157_v54 = vpop.xlane.xlu1 %156 }
 0x1aa   :  { %5261 = vrsqrt.f32 %v163_v52  ;;  %v161_v55 = vmul.f32 0.0078125, %v157_v54 }
 0x1ab   :  { %5263 = vrsqrt.f32 %v164_v53 }
 0x1ac   :  { %v165_v56 = vadd.f32 1e-05, %v161_v55 }
 0x1ae   :  { %5265 = vrsqrt.f32 %v165_v56 }
 0x1b0   :  { %v5260_v57 = vpop.eup %5259 }
 0x1b1   :  { %v170_v58 = vmul.f32 %v5260_v57, %v5690_v12 }
 0x1b3   :  { %v178_v63 = vmul.f32 %v4692_v59, %v170_v58 }
 0x1b4   :  { %v5262_v60 = vpop.eup %5261 }
 0x1b5   :  { %v5264_v61 = vpop.eup %5263  ;;  %v171_v62 = vmul.f32 %v5262_v60, %v5696_v19  ;;  %v186_v4 = vadd.f32 %v4693_v0, %v178_v63 }
 0x1b6   :  { %v172_v1 = vmul.f32 %v5264_v61, %v5692_v13 }
 0x1b7   :  { %v179_v2 = vmul.f32 %v4692_v59, %v171_v62 }
 0x1b8   :  { %v5266_v3 = vpop.eup %5265  ;;  %v180_v7 = vmul.f32 %v4692_v59, %v172_v1 }
 0x1b9   :  { %v187_v5 = vadd.f32 %v4693_v0, %v179_v2  ;;  %v173_v6 = vmul.f32 %v5266_v3, %v5698_v20 }
 0x1ba   :  { %v188_v10 = vadd.f32 %v4693_v0, %v180_v7 }
 0x1bb   :  { %v190_v8 = vpack.c.bf16 %v187_v5, %v186_v4  ;;  %v181_v9 = vmul.f32 %v4692_v59, %v173_v6 }
 0x1bd   :  { %385 = vmatmul.mubr.bf16.vlgmr.msra.gmra.mrb[0].mxu0 %v190_v8  ;;  %4966 = vmatprep.mubr.bf16.mxu1 %v190_v8  ;;  %v189_v11 = vadd.f32 %v4693_v0, %v181_v9 }
 0x1be   :  { %394 = vmatprep.mubr.bf16.mxu0 %v5544_v39 }
 0x1bf   :  { %v191_v12 = vpack.c.bf16 %v189_v11, %v188_v10 }
 0x1c1   :  { %4967 = vmatmul.mubr.bf16.vlgmr.msra.gmra.mrb[0].mxu1 %v191_v12 }
 0x1c2   :  { %4984 = vmatprep.mubr.msk.bf16.mxu1 %vm5548_vm0, %v5547_v25 }
 0x1c5   :  { %395 = vmatmul.mubr.bf16.gmra.mrb[4].mxu0 %v191_v12 }
 0x1c6   :  { %4972 = vmatprep.mubr.msk.bf16.mxu0 %vm5548_vm0, %v5547_v25 }
 0x290   :  { %v5712_v14 = vpop.f32.mrb[0].mxu0 }
 0x291   :  { %458 = vrot.lane.b32.xlu0 %v5712_v14, %s5545_s6  ;;  %v5716_v13 = vpop.f32.mrb[1].mxu0 }
 0x292   :  { %1062 = vrot.lane.b32.xlu1 %v5716_v13, %s5540_s0  ;;  %v5720_v15 = vpop.f32.mrb[2].mxu0 }
 0x293   :  { %v5722_v16 = vpop.f32.mrb[3].mxu0 }
 0x294   :  { %v5724_v17 = vpop.f32.mrb[0].mxu1 }
 0x295   :  { %1050 = vrot.lane.b32.xlu0 %v5716_v13, %s5545_s6  ;;  %v5728_v18 = vpop.f32.mrb[1].mxu1 }
 0x296   :  { %460 = vrot.lane.b32.xlu1 %v5720_v15, %s5545_s6  ;;  %v5732_v19 = vpop.f32.mrb[2].mxu1 }
 0x297   :  { %v5734_v20 = vpop.f32.mrb[3].mxu1 }
 0x298   :  { %v5736_v21 = vpop.f32.mrb[4].mxu0 }
 0x299   :  { %1074 = vrot.lane.b32.xlu0 %v5716_v13, %s5546_s3  ;;  %v5740_v22 = vpop.f32.mrb[5].mxu0 }
 0x29a   :  { %1052 = vrot.lane.b32.xlu1 %v5722_v16, %s5545_s6  ;;  %v5744_v23 = vpop.f32.mrb[6].mxu0 }
 0x29b   :  { %v5746_v24 = vpop.f32.mrb[7].mxu0 }
 0x29d   :  { %470 = vrot.lane.b32.xlu0 %v5712_v14, %s5540_s0 }
 0x29e   :  { %1064 = vrot.lane.b32.xlu1 %v5722_v16, %s5540_s0 }
 0x2a1   :  { %482 = vrot.lane.b32.xlu0 %v5712_v14, %s5546_s3 }
 0x2a2   :  { %1076 = vrot.lane.b32.xlu1 %v5722_v16, %s5546_s3 }
 0x2a5   :  { %462 = vrot.lane.b32.xlu0 %v5736_v21, %s5545_s6 }
 0x2a6   :  { %472 = vrot.lane.b32.xlu1 %v5720_v15, %s5540_s0 }
 0x2a9   :  { %1054 = vrot.lane.b32.xlu0 %v5740_v22, %s5545_s6 }
 0x2aa   :  { %484 = vrot.lane.b32.xlu1 %v5720_v15, %s5546_s3 }
 0x2ad   :  { %1066 = vrot.lane.b32.xlu0 %v5740_v22, %s5540_s0 }
 0x2ae   :  { %464 = vrot.lane.b32.xlu1 %v5744_v23, %s5545_s6 }
 0x2b1   :  { %1078 = vrot.lane.b32.xlu0 %v5740_v22, %s5546_s3 }
 0x2b2   :  { %1056 = vrot.lane.b32.xlu1 %v5746_v24, %s5545_s6 }
 0x2b5   :  { %474 = vrot.lane.b32.xlu0 %v5736_v21, %s5540_s0 }
 0x2b6   :  { %1068 = vrot.lane.b32.xlu1 %v5746_v24, %s5540_s0 }
 0x2b9   :  { %486 = vrot.lane.b32.xlu0 %v5736_v21, %s5546_s3 }
 0x2ba   :  { %1080 = vrot.lane.b32.xlu1 %v5746_v24, %s5546_s3 }
 0x2bd   :  { %1642 = vrot.lane.b32.xlu0 %v5728_v18, %s5545_s6 }
 0x2be   :  { %476 = vrot.lane.b32.xlu1 %v5744_v23, %s5540_s0 }
 0x2c1   :  { %1666 = vrot.lane.b32.xlu0 %v5728_v18, %s5546_s3 }
 0x2c2   :  { %488 = vrot.lane.b32.xlu1 %v5744_v23, %s5546_s3 }
 0x2c5   :  { %1646 = vrot.lane.b32.xlu0 %v5724_v17, %s5545_s6 }
 0x2c6   :  { %1644 = vrot.lane.b32.xlu1 %v5734_v20, %s5545_s6 }
 0x2c9   :  { %1670 = vrot.lane.b32.xlu0 %v5724_v17, %s5546_s3 }
 0x2ca   :  { %1654 = vrot.lane.b32.xlu1 %v5728_v18, %s5540_s0 }
 0x2ce   :  { %1656 = vrot.lane.b32.xlu1 %v5734_v20, %s5540_s0 }
 0x2d2   :  { %1668 = vrot.lane.b32.xlu1 %v5734_v20, %s5546_s3 }
 0x2d6   :  { %1648 = vrot.lane.b32.xlu1 %v5732_v19, %s5545_s6 }
 0x2da   :  { %1658 = vrot.lane.b32.xlu1 %v5724_v17, %s5540_s0 }
 0x2de   :  { %1660 = vrot.lane.b32.xlu1 %v5732_v19, %s5540_s0 }
 0x303   :  { %v459_v29 = vpop.permute.xlu0 %458 }
 0x304   :  { %v1063_v30 = vpop.permute.xlu1 %1062 }
 0x305   :  { %v1086_v38 = vcombine.low %v5716_v13, %v1063_v30  ;;  %v1087_v40 = vcombine.high %v5716_v13, %v1063_v30 }
 0x307   :  { %v1051_v33 = vpop.permute.xlu0 %1050  ;;  %v1094_v46 = vrot.slane %v1086_v38, %v5818_v37  ;;  %v1101_v47 = vrot.slane %v1087_v40, %v5818_v37 }
 0x308   :  { %v5815_v36 = vpop.permute.xlu1 %460 }
 0x30b   :  { %v1075_v42 = vpop.permute.xlu0 %1074 }
 0x30c   :  { %v1102_v43 = vcombine.low %v1051_v33, %v1075_v42  ;;  %v1103_v44 = vcombine.high %v1051_v33, %v1075_v42  ;;  %v1053_v45 = vpop.permute.xlu1 %1052 }
 0x30e   :  { %v1110_v48 = vrot.slane %v1102_v43, %v5818_v37  ;;  %v1117_v49 = vrot.slane %v1103_v44, %v5818_v37 }
 0x30f   :  { %v471_v51 = vpop.permute.xlu0 %470 }
 0x310   :  { %v1118_v52 = vcombine.low %v1094_v46, %v1110_v48  ;;  %v1119_v53 = vcombine.high %v1094_v46, %v1110_v48  ;;  %v1134_v54 = vcombine.low %v1101_v47, %v1117_v49  ;;  %v1135_v55 = vcombine.high %v1101_v47, %v1117_v49  ;;  %v1065_v56 = vpop.permute.xlu1 %1064 }
 0x311   :  { %v494_v57 = vcombine.low %v5712_v14, %v471_v51  ;;  %v495_v0 = vcombine.high %v5712_v14, %v471_v51  ;;  %v1154_v4 = vcombine.low %v5722_v16, %v1065_v56  ;;  %v1155_v5 = vcombine.high %v5722_v16, %v1065_v56 }
 0x312   :  { %v1126_v59 = vrot.slane %v1118_v52, %v5827_v50  ;;  %v1133_v60 = vrot.slane %v1119_v53, %v5827_v50  ;;  %v1142_v61 = vrot.slane %v1134_v54, %v5827_v50  ;;  %v1149_v62 = vrot.slane %v1135_v55, %v5827_v50 }
 0x313   :  { %v483_v58 = vpop.permute.xlu0 %482  ;;  %v502_v6 = vrot.slane %v494_v57, %v5818_v37  ;;  %v509_v27 = vrot.slane %v495_v0, %v5818_v37  ;;  %v1162_v31 = vrot.slane %v1154_v4, %v5818_v37  ;;  %v1169_v33 = vrot.slane %v1155_v5, %v5818_v37 }
 0x314   :  { %v1077_v63 = vpop.permute.xlu1 %1076  ;;  %v510_v1 = vcombine.low %v459_v29, %v483_v58  ;;  %v511_v2 = vcombine.high %v459_v29, %v483_v58  ;;  %v1358_v11 = vcombine.low %v1126_v59, %v1133_v60  ;;  %v4726_v12 = vcombine.high %v1126_v59, %v1133_v60 }
 0x315   :  { %v1170_v3 = vcombine.low %v1053_v45, %v1077_v63  ;;  %v1171_v9 = vcombine.high %v1053_v45, %v1077_v63  ;;  %v1374_v13 = vcombine.low %v1142_v61, %v1149_v62  ;;  %v4727_v14 = vcombine.high %v1142_v61, %v1149_v62 }
 0x316   :  { %v518_v7 = vrot.slane %v510_v1, %v5818_v37  ;;  %v525_v8 = vrot.slane %v511_v2, %v5818_v37  ;;  %v5848_v41 = vrot.slane %v1358_v11, %v5818_v37  ;;  %v5851_v42 = vrot.slane %v4726_v12, %v5818_v37 }
 0x317   :  { %v5840_v10 = vpop.permute.xlu0 %462  ;;  %v1178_v16 = vrot.slane %v1170_v3, %v5818_v37  ;;  %v1185_v38 = vrot.slane %v1171_v9, %v5818_v37  ;;  %v5854_v43 = vrot.slane %v1374_v13, %v5818_v37  ;;  %v5857_v44 = vrot.slane %v4727_v14, %v5818_v37 }
 0x318   :  { %v473_v26 = vpop.permute.xlu1 %472  ;;  %v526_v29 = vcombine.low %v502_v6, %v518_v7  ;;  %v527_v30 = vcombine.high %v502_v6, %v518_v7  ;;  %v542_v34 = vcombine.low %v509_v27, %v525_v8  ;;  %v543_v35 = vcombine.high %v509_v27, %v525_v8 }
 0x319   :  { %v1186_v48 = vcombine.low %v1162_v31, %v1178_v16  ;;  %v1187_v49 = vcombine.high %v1162_v31, %v1178_v16  ;;  %v1202_v53 = vcombine.low %v1169_v33, %v1185_v38  ;;  %v1203_v54 = vcombine.high %v1169_v33, %v1185_v38 }
 0x31a   :  { %v534_v46 = vrot.slane %v526_v29, %v5827_v50  ;;  %v541_v47 = vrot.slane %v527_v30, %v5827_v50  ;;  %v550_v51 = vrot.slane %v542_v34, %v5827_v50  ;;  %v557_v52 = vrot.slane %v543_v35, %v5827_v50 }
 0x31b   :  { %v1055_v40 = vpop.permute.xlu0 %1054  ;;  %v1390_v57 = vcombine.low %v5848_v41, %v5851_v42  ;;  %v1406_v58 = vcombine.low %v5854_v43, %v5857_v44  ;;  %v1194_v61 = vrot.slane %v1186_v48, %v5827_v50  ;;  %v1201_v62 = vrot.slane %v1187_v49, %v5827_v50 }
 0x31c   :  { %v485_v45 = vpop.permute.xlu1 %484  ;;  %v766_v59 = vcombine.low %v534_v46, %v541_v47  ;;  %v4718_v60 = vcombine.high %v534_v46, %v541_v47  ;;  %v562_v63 = vcombine.low %v5720_v15, %v473_v26  ;;  %v563_v0 = vcombine.high %v5720_v15, %v473_v26 }
 0x31d   :  { %v578_v1 = vcombine.low %v5815_v36, %v485_v45  ;;  %v579_v2 = vcombine.high %v5815_v36, %v485_v45  ;;  %v782_v3 = vcombine.low %v550_v51, %v557_v52  ;;  %v4719_v4 = vcombine.high %v550_v51, %v557_v52 }
 0x31e   :  { %v1210_v5 = vrot.slane %v1202_v53, %v5827_v50  ;;  %v1217_v6 = vrot.slane %v1203_v54, %v5827_v50  ;;  %v570_v8 = vrot.slane %v562_v63, %v5818_v37  ;;  %v577_v9 = vrot.slane %v563_v0, %v5818_v37 }
 0x31f   :  { %v1067_v55 = vpop.permute.xlu0 %1066  ;;  %v586_v11 = vrot.slane %v578_v1, %v5818_v37  ;;  %v593_v12 = vrot.slane %v579_v2, %v5818_v37  ;;  %v773_v15 = vrot.slane %v766_v59, %v5818_v37  ;;  %v781_v13 = vrot.slane %v4718_v60, %v5818_v37 }
 0x320   :  { %v5863_v56 = vpop.permute.xlu1 %464  ;;  %v1222_v36 = vcombine.low %v5740_v22, %v1067_v55  ;;  %v1223_v31 = vcombine.high %v5740_v22, %v1067_v55  ;;  %v5894_v48 = vrot.slane %v782_v3, %v5818_v37  ;;  %v5897_v49 = vrot.slane %v4719_v4, %v5818_v37 }
 0x321   :  { %v594_v27 = vcombine.low %v570_v8, %v586_v11  ;;  %v595_v29 = vcombine.high %v570_v8, %v586_v11  ;;  %v610_v30 = vcombine.low %v577_v9, %v593_v12  ;;  %v611_v16 = vcombine.high %v577_v9, %v593_v12 }
 0x322   :  { %v1230_v33 = vrot.slane %v1222_v36, %v5818_v37  ;;  %v1391_v54 = vcombine.high %v5848_v41, %v5851_v42  ;;  %v1426_v55 = vcombine.low %v1194_v61, %v1201_v62  ;;  %v4728_v59 = vcombine.high %v1194_v61, %v1201_v62 }
 0x323   :  { %v1079_v7 = vpop.permute.xlu0 %1078  ;;  %v602_v38 = vrot.slane %v594_v27, %v5827_v50  ;;  %v609_v45 = vrot.slane %v595_v29, %v5827_v50  ;;  %v618_v46 = vrot.slane %v610_v30, %v5827_v50  ;;  %v625_v47 = vrot.slane %v611_v16, %v5827_v50 }
 0x324   :  { %v1238_v14 = vcombine.low %v1055_v40, %v1079_v7  ;;  %v5884_v26 = vpop.permute.xlu1 %1056  ;;  %v1239_v34 = vcombine.high %v1055_v40, %v1079_v7  ;;  %v1442_v60 = vcombine.low %v1210_v5, %v1217_v6  ;;  %v4729_v63 = vcombine.high %v1210_v5, %v1217_v6 }
 0x325   :  { %v834_v52 = vcombine.low %v602_v38, %v609_v45  ;;  %v4720_v40 = vcombine.high %v602_v38, %v609_v45  ;;  %v798_v1 = vcombine.low %v773_v15, %v781_v13  ;;  %v850_v2 = vcombine.low %v618_v46, %v625_v47 }
 0x326   :  { %v1246_v35 = vrot.slane %v1238_v14, %v5818_v37  ;;  %v1253_v53 = vrot.slane %v1239_v34, %v5818_v37  ;;  %v4721_v3 = vcombine.high %v618_v46, %v625_v47  ;;  %v1237_v4 = vrot.slane %v1223_v31, %v5818_v37 }
 0x327   :  { %v799_v7 = vcombine.high %v773_v15, %v781_v13  ;;  %v814_v8 = vcombine.low %v5894_v48, %v5897_v49  ;;  %v475_v61 = vpop.permute.xlu0 %474  ;;  %v5914_v62 = vrot.slane %v834_v52, %v5818_v37  ;;  %v5917_v5 = vrot.slane %v4720_v40, %v5818_v37 }
 0x328   :  { %v1254_v22 = vcombine.low %v1230_v33, %v1246_v35  ;;  %v1255_v51 = vcombine.high %v1230_v33, %v1246_v35  ;;  %v5902_v0 = vpop.permute.xlu1 %1068  ;;  %v1270_v6 = vcombine.low %v1237_v4, %v1253_v53  ;;  %v1271_v12 = vcombine.high %v1237_v4, %v1253_v53 }
 0x329   :  { %v1433_v15 = vrot.slane %v1426_v55, %v5818_v37  ;;  %v1441_v13 = vrot.slane %v4728_v59, %v5818_v37  ;;  %v1449_v36 = vrot.slane %v1442_v60, %v5818_v37  ;;  %v1457_v14 = vrot.slane %v4729_v63, %v5818_v37 }
 0x32a   :  { %v5908_v9 = vrot.slane %v1254_v22, %v5827_v50  ;;  %v5911_v11 = vrot.slane %v1255_v51, %v5827_v50  ;;  %v5924_v27 = vrot.slane %v850_v2, %v5818_v37  ;;  %v5927_v29 = vrot.slane %v4721_v3, %v5818_v37 }
 0x32b   :  { %v630_v30 = vcombine.low %v5736_v21, %v475_v61  ;;  %v1407_v16 = vcombine.high %v5854_v43, %v5857_v44  ;;  %v5933_v31 = vrot.slane %v798_v1, %v5827_v50  ;;  %v5936_v33 = vrot.slane %v799_v7, %v5827_v50  ;;  %v487_v40 = vpop.permute.xlu0 %486 }
 0x32c   :  { %v815_v34 = vcombine.high %v5894_v48, %v5897_v49  ;;  %v5941_v35 = vrot.slane %v814_v8, %v5827_v50  ;;  %v1081_v38 = vpop.permute.xlu1 %1080  ;;  %v866_v45 = vcombine.low %v5914_v62, %v5917_v5  ;;  %v5946_v46 = vrot.slane %v1270_v6, %v5827_v50 }
 0x32d   :  { %v5949_v47 = vrot.slane %v1271_v12, %v5827_v50  ;;  %v1494_v22 = vcombine.low %v5908_v9, %v5911_v11  ;;  %v5957_v48 = vrot.slane %v1390_v57, %v5827_v50  ;;  %v5963_v49 = vrot.slane %v1406_v58, %v5827_v50 }
 0x32e   :  { %v1458_v51 = vcombine.low %v1433_v15, %v1441_v13  ;;  %v1474_v52 = vcombine.low %v1449_v36, %v1457_v14  ;;  %v882_v53 = vcombine.low %v5924_v27, %v5927_v29  ;;  %v631_v55 = vcombine.high %v5736_v21, %v475_v61 }
 0x32f   :  { %v638_v59 = vrot.slane %v630_v30, %v5818_v37  ;;  %v1290_v41 = vcombine.low %v5746_v24, %v5902_v0  ;;  %v5978_v44 = vrot.slane %v1391_v54, %v5827_v50  ;;  %v1459_v57 = vcombine.high %v1433_v15, %v1441_v13 }
 0x330   :  { %v5972_v42 = vrot.slane %v1458_v51, %v5827_v50  ;;  %v5975_v43 = vrot.slane %v1474_v52, %v5827_v50  ;;  %v5981_v58 = vrot.slane %v1407_v16, %v5827_v50  ;;  %v1475_v60 = vcombine.high %v1449_v36, %v1457_v14  ;;  %v5993_v4 = vpop.permute.xlu1 %476 }
 0x331   :  { %v646_v21 = vcombine.low %v5840_v10, %v487_v40  ;;  %v647_v63 = vcombine.high %v5840_v10, %v487_v40  ;;  %v1422_v1 = vcombine.low %v5957_v48, %v5963_v49  ;;  %v5990_v3 = vrot.slane %v1459_v57, %v5827_v50 }
 0x332   :  { %v1490_v2 = vcombine.low %v5972_v42, %v5975_v43  ;;  %v1306_v54 = vcombine.low %v5884_v26, %v1081_v38  ;;  %v645_v7 = vrot.slane %v631_v55, %v5818_v37  ;;  %v5997_v8 = vrot.slane %v1475_v60, %v5827_v50 }
 0x333   :  { %v654_v10 = vrot.slane %v646_v21, %v5818_v37  ;;  %v661_v61 = vrot.slane %v647_v63, %v5818_v37  ;;  %v1298_v6 = vrot.slane %v1290_v41, %v5818_v37  ;;  %v1307_v15 = vcombine.high %v5884_v26, %v1081_v38 }
 0x334   :  { %v1630_v12 = vpack.c.bf16 %v1490_v2, %v1422_v1  ;;  %v1314_v13 = vrot.slane %v1306_v54, %v5818_v37  ;;  %v1424_v36 = vcombine.low %v5978_v44, %v5981_v58  ;;  %v1492_v14 = vcombine.low %v5990_v3, %v5997_v8 }
 0x335   :  { %v662_v30 = vcombine.low %v638_v59, %v654_v10  ;;  %v663_v16 = vcombine.high %v638_v59, %v654_v10  ;;  %v6009_v51 = vrot.slane %v866_v45, %v5827_v50  ;;  %v6012_v52 = vrot.slane %v882_v53, %v5827_v50  ;;  %v489_v53 = vpop.permute.xlu1 %488 }
 0x336   :  { %v1291_v40 = vcombine.high %v5746_v24, %v5902_v0  ;;  %v2242_v26 = vsel %vm2237_vm1, %v1630_v12, 0  ;;  %v1632_v38 = vpack.c.bf16 %v1492_v14, %v1424_v36  ;;  %v678_v55 = vcombine.low %v645_v7, %v661_v61 }
 0x337   :  { %4971 = vmatpush3.bf16.xpose.msra.mxu0 %v2242_v26  ;;  %v679_v41 = vcombine.high %v645_v7, %v661_v61  ;;  %v1322_v57 = vcombine.low %v1298_v6, %v1314_v13  ;;  %v670_v60 = vrot.slane %v662_v30, %v5827_v50  ;;  %v677_v59 = vrot.slane %v663_v16, %v5827_v50  ;;  %v6071_v26 = vpop.permute.xlu0 %1642 }
 0x338   :  { %v1321_v45 = vrot.slane %v1307_v15, %v5818_v37  ;;  %v1323_v21 = vcombine.high %v1298_v6, %v1314_v13  ;;  %4976 = vmatprep.subr.bf16.mxu0 %v5547_v25  ;;  %v867_v24 = vcombine.high %v5914_v62, %v5917_v5  ;;  %v883_v0 = vcombine.high %v5924_v27, %v5927_v29 }
 0x339   :  { %v4730_v63 = vcombine.high %v5908_v9, %v5911_v11  ;;  %v2336_v1 = vsel %vm2237_vm1, %v1632_v38, 0  ;;  %v6029_v2 = vrot.slane %v815_v34, %v5827_v50  ;;  %v830_v54 = vcombine.low %v5933_v31, %v5941_v35 }
 0x33a   :  { %v1510_v7 = vcombine.low %v5946_v46, %v5949_v47  ;;  %v1305_v10 = vrot.slane %v1291_v40, %v5818_v37  ;;  %4983 = vmatpush3.bf16.xpose.msra.mxu1 %v2336_v1  ;;  %v898_v62 = vcombine.low %v6009_v51, %v6012_v52  ;;  %v6039_v5 = vrot.slane %v678_v55, %v5827_v50  ;;  %v6075_v55 = vpop.permute.xlu1 %1644 }
 0x33b   :  { %v6042_v27 = vrot.slane %v679_v41, %v5827_v50  ;;  %v6045_v29 = vrot.slane %v1322_v57, %v5827_v50  ;;  %4994 = vmatprep.subr.bf16.mxu1 %v5547_v25  ;;  %v902_v34 = vcombine.low %v670_v60, %v677_v59  ;;  %v4722_v61 = vcombine.high %v670_v60, %v677_v59 }
 0x33c   :  { %v6049_v6 = vrot.slane %v1323_v21, %v5827_v50  ;;  %v1338_v12 = vcombine.low %v1305_v10, %v1321_v45  ;;  %v6052_v15 = vrot.slane %v867_v24, %v5827_v50  ;;  %v6055_v13 = vrot.slane %v883_v0, %v5827_v50 }
 0x33d   :  { %v6061_v36 = vrot.slane %v1494_v22, %v5818_v37  ;;  %v6064_v14 = vrot.slane %v4730_v63, %v5818_v37  ;;  %v6067_v30 = vrot.slane %v1510_v7, %v5818_v37  ;;  %v4731_v16 = vcombine.high %v5946_v46, %v5949_v47 }
 0x33e   :  { %v1339_v40 = vcombine.high %v1305_v10, %v1321_v45  ;;  %v698_v38 = vcombine.low %v5744_v23, %v5993_v4  ;;  %v918_v9 = vcombine.low %v6039_v5, %v6042_v27  ;;  %v4723_v11 = vcombine.high %v6039_v5, %v6042_v27 }
 0x33f   :  { %v699_v22 = vcombine.high %v5744_v23, %v5993_v4  ;;  %v1038_v41 = vpack.c.bf16 %v898_v62, %v830_v54  ;;  %v6084_v57 = vrot.slane %v902_v34, %v5818_v37  ;;  %v6087_v60 = vrot.slane %v4722_v61, %v5818_v37  ;;  %v6118_v62 = vpop.permute.xlu0 %1666 }
 0x340   :  { %v6090_v59 = vrot.slane %v1338_v12, %v5827_v50  ;;  %v1562_v45 = vcombine.low %v6045_v29, %v6049_v6  ;;  %v832_v21 = vcombine.low %v5936_v33, %v6029_v2  ;;  %v900_v23 = vcombine.low %v6052_v15, %v6055_v13 }
 0x341   :  { %4973 = vmatmul.mubr.msk.bf16.vlgmr.msra.gmra.mrb[8].mxu0 %vm2237_vm1, %v1038_v41  ;;  %v1423_v4 = vcombine.high %v5957_v48, %v5963_v49  ;;  %v1491_v24 = vcombine.high %v5972_v42, %v5975_v43  ;;  %v6104_v0 = vrot.slane %v1339_v40, %v5827_v50  ;;  %v4732_v63 = vcombine.high %v6045_v29, %v6049_v6 }
 0x342   :  { %v714_v1 = vcombine.low %v5863_v56, %v489_v53  ;;  %v715_v54 = vcombine.high %v5863_v56, %v489_v53  ;;  %4978 = vmatprep.mubr.msk.bf16.mxu0 %vm5548_vm0, %v5547_v25  ;;  %v1040_v7 = vpack.c.bf16 %v900_v23, %v832_v21  ;;  %v831_v48 = vcombine.high %v5933_v31, %v5941_v35  ;;  %v1655_v53 = vpop.permute.xlu1 %1654 }
 0x343   :  { %v1631_v10 = vpack.c.bf16 %v1491_v24, %v1423_v4  ;;  %v899_v49 = vcombine.high %v6009_v51, %v6012_v52  ;;  %v706_v42 = vrot.slane %v698_v38, %v5818_v37  ;;  %v713_v43 = vrot.slane %v699_v22, %v5818_v37 }
 0x344   :  { %v722_v5 = vrot.slane %v714_v1, %v5818_v37  ;;  %v729_v56 = vrot.slane %v715_v54, %v5818_v37  ;;  %4985 = vmatmul.mubr.msk.bf16.vlgmr.msra.gmra.mrb[4].mxu1 %vm2237_vm1, %v1040_v7  ;;  %v1425_v31 = vcombine.high %v5978_v44, %v5981_v58  ;;  %v1493_v35 = vcombine.high %v5990_v3, %v5997_v8 }
 0x345   :  { %v2289_v27 = vsel %vm2237_vm1, %v1631_v10, 0  ;;  %v1039_v34 = vpack.c.bf16 %v899_v49, %v831_v48  ;;  %v6129_v40 = vrot.slane %v918_v9, %v5818_v37  ;;  %v1694_v38 = vcombine.low %v6071_v26, %v6118_v62  ;;  %4996 = vmatprep.mubr.msk.bf16.mxu1 %vm5548_vm0, %v5547_v25 }
 0x346   :  { %4977 = vmatpush3.bf16.xpose.msra.mxu0 %v2289_v27  ;;  %v730_v51 = vcombine.low %v706_v42, %v722_v5  ;;  %v731_v52 = vcombine.high %v706_v42, %v722_v5  ;;  %v746_v61 = vcombine.low %v713_v43, %v729_v56  ;;  %v747_v12 = vcombine.high %v713_v43, %v729_v56  ;;  %v1657_v5 = vpop.permute.xlu1 %1656 }
 0x347   :  { %4988 = vmatprep.subr.bf16.mxu0 %v5547_v25  ;;  %v1633_v22 = vpack.c.bf16 %v1493_v35, %v1425_v31  ;;  %v1678_v41 = vcombine.low %v5728_v18, %v1655_v53  ;;  %v6142_v9 = vrot.slane %v4723_v11, %v5818_v37  ;;  %v934_v21 = vcombine.low %v6084_v57, %v6087_v60 }
 0x348   :  { %v738_v44 = vrot.slane %v730_v51, %v5827_v50  ;;  %v745_v58 = vrot.slane %v731_v52, %v5827_v50  ;;  %v754_v3 = vrot.slane %v746_v61, %v5827_v50  ;;  %v761_v8 = vrot.slane %v747_v12, %v5827_v50 }
 0x349   :  { %v935_v23 = vcombine.high %v6084_v57, %v6087_v60  ;;  %v1686_v4 = vrot.slane %v1678_v41, %v5818_v37  ;;  %v1578_v10 = vcombine.low %v6090_v59, %v6104_v0  ;;  %v4733_v48 = vcombine.high %v6090_v59, %v6104_v0 }
 0x34a   :  { %v970_v24 = vcombine.low %v738_v44, %v745_v58  ;;  %v4724_v1 = vcombine.high %v738_v44, %v745_v58  ;;  %v986_v54 = vcombine.low %v754_v3, %v761_v8  ;;  %v4725_v7 = vcombine.high %v754_v3, %v761_v8  ;;  %v1669_v41 = vpop.permute.xlu1 %1668 }
 0x34b   :  { %v1702_v11 = vrot.slane %v1694_v38, %v5818_v37  ;;  %v1679_v49 = vcombine.high %v5728_v18, %v1655_v53  ;;  %v950_v59 = vcombine.low %v6129_v40, %v6142_v9  ;;  %v1695_v0 = vcombine.high %v6071_v26, %v6118_v62 }
 0x34c   :  { %v6156_v42 = vrot.slane %v970_v24, %v5818_v37  ;;  %v6159_v57 = vrot.slane %v4724_v1, %v5818_v37  ;;  %v6162_v60 = vrot.slane %v986_v54, %v5818_v37  ;;  %v6165_v43 = vrot.slane %v4725_v7, %v5818_v37 }
 0x34d   :  { %4979 = vmatmul.mubr.msk.bf16.vlgmr.msra.gmra.mrb[12].mxu0 %vm2237_vm1, %v1039_v34  ;;  %v2383_v18 = vsel %vm2237_vm1, %v1633_v22, 0  ;;  %v1710_v56 = vcombine.low %v1686_v4, %v1702_v11  ;;  %v6177_v53 = vrot.slane %v4731_v16, %v5818_v37  ;;  %v6183_v27 = vrot.slane %v1562_v45, %v5818_v37 }
 0x34e   :  { %v1002_v26 = vcombine.low %v6156_v42, %v6159_v57  ;;  %v1018_v62 = vcombine.low %v6162_v60, %v6165_v43  ;;  %4989 = vmatpush3.bf16.xpose.msra.mxu0 %v2383_v18  ;;  %v951_v34 = vcombine.high %v6129_v40, %v6142_v9  ;;  %v6192_v46 = vrot.slane %v4732_v63, %v5818_v37 }
 0x34f   :  { %v1693_v47 = vrot.slane %v1679_v49, %v5818_v37  ;;  %v1711_v16 = vcombine.high %v1686_v4, %v1702_v11  ;;  %4990 = vmatprep.mubr.msk.bf16.mxu0 %vm5548_vm0, %v5547_v25  ;;  %v942_v29 = vrot.slane %v934_v21, %v5827_v50  ;;  %v6199_v6 = vrot.slane %v935_v23, %v5827_v50 }
 0x350   :  { %v6202_v45 = vrot.slane %v1578_v10, %v5818_v37  ;;  %v6205_v31 = vrot.slane %v4733_v48, %v5818_v37  ;;  %5000 = vmatprep.subr.bf16.mxu0 %v5547_v25  ;;  %v958_v63 = vrot.slane %v950_v59, %v5827_v50  ;;  %v1709_v35 = vrot.slane %v1695_v0, %v5818_v37 }
 0x351   :  { %v6211_v51 = vrot.slane %v1710_v56, %v5827_v50  ;;  %v1746_v52 = vcombine.low %v5734_v20, %v1657_v5  ;;  %v1010_v61 = vrot.slane %v1002_v26, %v5827_v50  ;;  %v1026_v12 = vrot.slane %v1018_v62, %v5827_v50 }
 0x352   :  { %v833_v38 = vcombine.high %v5936_v33, %v6029_v2  ;;  %v901_v22 = vcombine.high %v6052_v15, %v6055_v13  ;;  %v6221_v44 = vrot.slane %v1711_v16, %v5827_v50  ;;  %v1726_v58 = vcombine.low %v1693_v47, %v1709_v35 }
 0x353   :  { %v1526_v3 = vcombine.low %v6061_v36, %v6064_v14  ;;  %v1542_v8 = vcombine.low %v6067_v30, %v6177_v53  ;;  %v1747_v21 = vcombine.high %v5734_v20, %v1657_v5  ;;  %v1594_v33 = vcombine.low %v6183_v27, %v6192_v46 }
 0x354   :  { %v1041_v23 = vpack.c.bf16 %v901_v22, %v833_v38  ;;  %v1610_v2 = vcombine.low %v6202_v45, %v6205_v31  ;;  %v1762_v4 = vcombine.low %v6075_v55, %v1669_v41  ;;  %v1763_v24 = vcombine.high %v6075_v55, %v1669_v41 }
 0x355   :  { %v1534_v15 = vrot.slane %v1526_v3, %v5827_v50  ;;  %v1550_v13 = vrot.slane %v1542_v8, %v5827_v50  ;;  %v1602_v1 = vrot.slane %v1594_v33, %v5827_v50  ;;  %v966_v54 = vcombine.low %v942_v29, %v958_v63 }
 0x356   :  { %4991 = vmatmul.mubr.msk.bf16.vlgmr.msra.gmra.mrb[16].mxu0 %vm2237_vm1, %v1041_v23  ;;  %v1618_v20 = vrot.slane %v1610_v2, %v5827_v50  ;;  %v1034_v7 = vcombine.low %v1010_v61, %v1026_v12  ;;  %v1754_v10 = vrot.slane %v1746_v52, %v5818_v37  ;;  %v1770_v11 = vrot.slane %v1762_v4, %v5818_v37 }
 0x357   :  { %v1558_v48 = vcombine.low %v1534_v15, %v1550_v13  ;;  %v1777_v49 = vrot.slane %v1763_v24, %v5818_v37  ;;  %5002 = vmatprep.mubr.msk.bf16.mxu0 %vm5548_vm0, %v5547_v25  ;;  %v1559_v55 = vcombine.high %v1534_v15, %v1550_v13  ;;  %v1727_v18 = vcombine.high %v1693_v47, %v1709_v35 }
 0x358   :  { %v1626_v5 = vcombine.low %v1602_v1, %v1618_v20  ;;  %v1627_v59 = vcombine.high %v1602_v1, %v1618_v20  ;;  %v1042_v0 = vpack.c.bf16 %v1034_v7, %v966_v54  ;;  %v1761_v56 = vrot.slane %v1747_v21, %v5818_v37 }
 0x359   :  { %v1778_v26 = vcombine.low %v1754_v10, %v1770_v11  ;;  %v967_v62 = vcombine.high %v942_v29, %v958_v63  ;;  %v1779_v52 = vcombine.high %v1754_v10, %v1770_v11  ;;  %v1035_v22 = vcombine.high %v1010_v61, %v1026_v12 }
 0x35a   :  { %v1634_v16 = vpack.c.bf16 %v1626_v5, %v1558_v48  ;;  %v1635_v38 = vpack.c.bf16 %v1627_v59, %v1559_v55  ;;  %v1003_v41 = vcombine.high %v6156_v42, %v6159_v57  ;;  %v1019_v3 = vcombine.high %v6162_v60, %v6165_v43 }
 0x35b   :  { %v1794_v8 = vcombine.low %v1761_v56, %v1777_v49  ;;  %v1527_v23 = vcombine.high %v6061_v36, %v6064_v14  ;;  %v1795_v21 = vcombine.high %v1761_v56, %v1777_v49  ;;  %v1043_v29 = vpack.c.bf16 %v1035_v22, %v967_v62 }
 0x35c   :  { %v2430_v47 = vsel %vm2237_vm1, %v1634_v16, 0  ;;  %v2477_v35 = vsel %vm2237_vm1, %v1635_v38, 0  ;;  %v1734_v63 = vrot.slane %v1726_v58, %v5827_v50  ;;  %v1741_v61 = vrot.slane %v1727_v18, %v5827_v50 }
 0x35d   :  { %4995 = vmatpush3.bf16.xpose.msra.mxu1 %v2430_v47  ;;  %5001 = vmatpush3.bf16.xpose.msra.mxu0 %v2477_v35  ;;  %v1786_v42 = vrot.slane %v1778_v26, %v5827_v50  ;;  %v1793_v57 = vrot.slane %v1779_v52, %v5827_v50  ;;  %v1543_v36 = vcombine.high %v6067_v30, %v6177_v53 }
 0x35e   :  { %5006 = vmatprep.subr.bf16.mxu1 %v5547_v25  ;;  %5012 = vmatprep.subr.bf16.mxu0 %v5547_v25  ;;  %v1595_v14 = vcombine.high %v6183_v27, %v6192_v46  ;;  %v965_v60 = vrot.slane %v951_v34, %v5827_v50  ;;  %v1950_v43 = vcombine.low %v6211_v51, %v6221_v44 }
 0x35f   :  { %v1541_v12 = vrot.slane %v1527_v23, %v5827_v50  ;;  %v1611_v58 = vcombine.high %v6202_v45, %v6205_v31  ;;  %v1802_v33 = vrot.slane %v1794_v8, %v5827_v50  ;;  %v1809_v30 = vrot.slane %v1795_v21, %v5827_v50 }
 0x360   :  { %v1557_v53 = vrot.slane %v1543_v36, %v5827_v50  ;;  %v1609_v27 = vrot.slane %v1595_v14, %v5827_v50  ;;  %v1017_v46 = vrot.slane %v1003_v41, %v5827_v50  ;;  %v1033_v40 = vrot.slane %v1019_v3, %v5827_v50 }
 0x361   :  { %v4734_v9 = vcombine.high %v6211_v51, %v6221_v44  ;;  %v1625_v34 = vrot.slane %v1611_v58, %v5827_v50  ;;  %v1966_v2 = vcombine.low %v1734_v63, %v1741_v61  ;;  %v4735_v15 = vcombine.high %v1734_v63, %v1741_v61 }
 0x362   :  { %v2018_v45 = vcombine.low %v1786_v42, %v1793_v57  ;;  %v4736_v31 = vcombine.high %v1786_v42, %v1793_v57  ;;  %v1560_v13 = vcombine.low %v1541_v12, %v1557_v53  ;;  %v1561_v24 = vcombine.high %v1541_v12, %v1557_v53 }
 0x363   :  { %v1628_v4 = vcombine.low %v1609_v27, %v1625_v34  ;;  %v1629_v1 = vcombine.high %v1609_v27, %v1625_v34  ;;  %v2034_v20 = vcombine.low %v1802_v33, %v1809_v30  ;;  %v4737_v54 = vcombine.high %v1802_v33, %v1809_v30 }
 0x364   :  { %4997 = vmatmul.mubr.msk.bf16.vlgmr.msra.gmra.mrb[8].mxu1 %vm2237_vm1, %v1042_v0  ;;  %5003 = vmatmul.mubr.msk.bf16.vlgmr.msra.gmra.mrb[20].mxu0 %vm2237_vm1, %v1043_v29  ;;  %v1957_v7 = vrot.slane %v1950_v43, %v5818_v37  ;;  %v1965_v51 = vrot.slane %v4734_v9, %v5818_v37  ;;  %v1973_v48 = vrot.slane %v1966_v2, %v5818_v37  ;;  %v2234_v2 = vand.u32 127, %v499_v28 }
 0x365   :  { %v1636_v44 = vpack.c.bf16 %v1628_v4, %v1560_v13  ;;  %v1637_v10 = vpack.c.bf16 %v1629_v1, %v1561_v24  ;;  %5008 = vmatprep.mubr.msk.bf16.mxu1 %vm5548_vm0, %v5547_v25  ;;  %v1981_v11 = vrot.slane %v4735_v15, %v5818_v37  ;;  %5014 = vmatprep.mubr.msk.bf16.mxu0 %vm5548_vm0, %v5547_v25  ;;  %v2232_v15 = vadd.s32 8, %v5813_v32 }
 0x366   :  { %v968_v49 = vcombine.low %v6199_v6, %v965_v60  ;;  %v1036_v5 = vcombine.low %v1017_v46, %v1033_v40  ;;  %v2025_v55 = vrot.slane %v2018_v45, %v5818_v37  ;;  %v2033_v59 = vrot.slane %v4736_v31, %v5818_v37 }
 0x367   :  { %v2524_v0 = vsel %vm2237_vm1, %v1636_v44, 0  ;;  %v2571_v18 = vsel %vm2237_vm1, %v1637_v10, 0  ;;  %v2041_v56 = vrot.slane %v2034_v20, %v5818_v37  ;;  %v2049_v26 = vrot.slane %v4737_v54, %v5818_v37 }
 0x368   :  { %5007 = vmatpush3.bf16.xpose.msra.mxu1 %v2524_v0  ;;  %5013 = vmatpush3.bf16.xpose.msra.mxu0 %v2571_v18  ;;  %v1044_v62 = vpack.c.bf16 %v1036_v5, %v968_v49  ;;  %v969_v16 = vcombine.high %v6199_v6, %v965_v60  ;;  %v1037_v38 = vcombine.high %v1017_v46, %v1033_v40 }
 0x369   :  { %5018 = vmatprep.subr.bf16.mxu1 %v5547_v25  ;;  %5024 = vmatprep.subr.bf16.mxu0 %v5547_v25  ;;  %v1982_v52 = vcombine.low %v1957_v7, %v1965_v51  ;;  %v1998_v22 = vcombine.low %v1973_v48, %v1981_v11  ;;  %v2050_v3 = vcombine.low %v2025_v55, %v2033_v59 }
 0x36a   :  { %v1045_v41 = vpack.c.bf16 %v1037_v38, %v969_v16  ;;  %v2066_v47 = vcombine.low %v2041_v56, %v2049_v26  ;;  %v1983_v35 = vcombine.high %v1957_v7, %v1965_v51  ;;  %v1999_v29 = vcombine.high %v1973_v48, %v1981_v11 }
 0x36b   :  { %v1990_v8 = vrot.slane %v1982_v52, %v5827_v50  ;;  %v2006_v23 = vrot.slane %v1998_v22, %v5827_v50  ;;  %v2058_v21 = vrot.slane %v2050_v3, %v5827_v50  ;;  %v2051_v63 = vcombine.high %v2025_v55, %v2033_v59 }
 0x36c   :  { %v2067_v6 = vcombine.high %v2041_v56, %v2049_v26  ;;  %v2074_v42 = vrot.slane %v2066_v47, %v5827_v50  ;;  %v1997_v57 = vrot.slane %v1983_v35, %v5827_v50  ;;  %v2013_v36 = vrot.slane %v1999_v29, %v5827_v50 }
 0x36d   :  { %v2014_v61 = vcombine.low %v1990_v8, %v2006_v23  ;;  %v2065_v14 = vrot.slane %v2051_v63, %v5827_v50  ;;  %v2015_v12 = vcombine.high %v1990_v8, %v2006_v23  ;;  %vm6324_vm2 = vcmp.le.s32.totalorder %v2234_v2, %v5813_v32 }
 0x36e   :  { %v2081_v60 = vrot.slane %v2067_v6, %v5827_v50  ;;  %v2082_v43 = vcombine.low %v2058_v21, %v2074_v42  ;;  %v2083_v58 = vcombine.high %v2058_v21, %v2074_v42  ;;  %v2016_v33 = vcombine.low %v1997_v57, %v2013_v36 }
 0x36f   :  { %5009 = vmatmul.mubr.msk.bf16.vlgmr.msra.gmra.mrb[12].mxu1 %vm2237_vm1, %v1044_v62  ;;  %5015 = vmatmul.mubr.msk.bf16.vlgmr.msra.gmra.mrb[24].mxu0 %vm2237_vm1, %v1045_v41  ;;  %v2017_v53 = vcombine.high %v1997_v57, %v2013_v36  ;;  %vm6328_vm4 = vcmp.le.s32.totalorder %v2234_v2, %v2232_v15 }
 0x370   :  { %5020 = vmatprep.mubr.msk.bf16.mxu1 %vm5548_vm0, %v5547_v25  ;;  %5026 = vmatprep.mubr.msk.bf16.mxu0 %vm5548_vm0, %v5547_v25  ;;  %v2084_v30 = vcombine.low %v2065_v14, %v2081_v60  ;;  %v2085_v27 = vcombine.high %v2065_v14, %v2081_v60  ;;  %v2222_v46 = vpack.c.bf16 %v2082_v43, %v2014_v61 }
 0x371   :  { %v2223_v40 = vpack.c.bf16 %v2083_v58, %v2015_v12 }
 0x372   :  { %v6315_v9 = vpack.c.bf16 %v2084_v30, %v2016_v33  ;;  %v6317_v34 = vpack.c.bf16 %v2085_v27, %v2017_v53  ;;  %5019 = vmatpush3.bf16.msra.mxu1 %v2222_v46 }
 0x373   :  { %5025 = vmatpush3.bf16.msra.mxu0 %v2223_v40  ;;  %5030 = vmatprep.subr.bf16.mxu1 %v5547_v25 }
 0x374   :  { %5036 = vmatprep.subr.bf16.mxu0 %v5547_v25 }
 0x414   :  { %v2278_v31 = vpop.f32.mrb[8].mxu0 }
 0x415   :  { %v6334_v4 = vsel %vm6324_vm2, %v2278_v31, -1e+30  ;;  %v4974_v24 = vpop.f32.mrb[9].mxu0 }
 0x416   :  { %v2281_v1 = vpop.f32.mrb[10].mxu0  ;;  %v2635_v28 = vsel %vm2634_vm3, %v6334_v4, -inf }
 0x417   :  { %v6340_v20 = vsel %vm6328_vm4, %v2281_v1, -1e+30  ;;  %2636 = vmax.xlane.f32.xlu0 %v2635_v28  ;;  %v4975_v54 = vpop.f32.mrb[11].mxu0  ;;  %v2372_v7 = vpop.f32.mrb[4].mxu1 }
 0x418   :  { %v2638_v51 = vsel %vm2634_vm3, %v6340_v20, -inf  ;;  %v6346_v44 = vsel %vm6324_vm2, %v2372_v7, -1e+30  ;;  %v4986_v10 = vpop.f32.mrb[5].mxu1 }
 0x419   :  { %2639 = vmax.xlane.f32.xlu1 %v2638_v51  ;;  %v2375_v48 = vpop.f32.mrb[6].mxu1  ;;  %v2647_v11 = vsel %vm2634_vm3, %v6346_v44, -inf }
 0x41a   :  { %v6352_v49 = vsel %vm6328_vm4, %v2375_v48, -1e+30  ;;  %v4987_v5 = vpop.f32.mrb[7].mxu1 }
 0x41b   :  { %2648 = vmax.xlane.f32.xlu0 %v2647_v11  ;;  %v2650_v55 = vsel %vm2634_vm3, %v6352_v49, -inf  ;;  %v6430_v5 = vpop.permute.xlu1 %1648 }
 0x41d   :  { %2651 = vmax.xlane.f32.xlu1 %v2650_v55  ;;  %v1647_v55 = vpop.permute.xlu0 %1646 }
 0x420   :  { %v2325_v59 = vpop.f32.mrb[12].mxu0 }
 0x421   :  { %v6358_v0 = vsel %vm6324_vm2, %v2325_v59, -1e+30  ;;  %v4980_v18 = vpop.f32.mrb[13].mxu0  ;;  %v1659_v59 = vpop.permute.xlu1 %1658 }
 0x422   :  { %v2328_v56 = vpop.f32.mrb[14].mxu0  ;;  %v2641_v26 = vsel %vm2634_vm3, %v6358_v0, -inf  ;;  %v1671_v18 = vpop.permute.xlu0 %1670 }
 0x423   :  { %2642 = vmax.xlane.f32.xlu0 %v2641_v26  ;;  %v4981_v62 = vpop.f32.mrb[15].mxu0  ;;  %v6370_v63 = vsel %vm6328_vm4, %v2328_v56, -1e+30 }
 0x424   :  { %v2644_v14 = vsel %vm2634_vm3, %v6370_v63, -inf }
 0x425   :  { %v6432_v56 = vpop.permute.xlu1 %1660 }
 0x429   :  { %v2419_v16 = vpop.f32.mrb[16].mxu0 }
 0x42a   :  { %v4992_v38 = vpop.f32.mrb[17].mxu0  ;;  %v6386_v60 = vsel %vm6324_vm2, %v2419_v16, -1e+30 }
 0x42b   :  { %v2422_v52 = vpop.f32.mrb[18].mxu0  ;;  %v2653_v12 = vsel %vm2634_vm3, %v6386_v60, -inf }
 0x42c   :  { %v4993_v22 = vpop.f32.mrb[19].mxu0  ;;  %v6394_v58 = vsel %vm6328_vm4, %v2422_v52, -1e+30 }
 0x42d   :  { %v2656_v24 = vsel %vm2634_vm3, %v6394_v58, -inf }
 0x437   :  { %v2466_v41 = vpop.f32.mrb[8].mxu1  ;;  %v2513_v3 = vpop.f32.mrb[20].mxu0 }
 0x438   :  { %v6364_v8 = vsel %vm6324_vm2, %v2466_v41, -1e+30  ;;  %v4998_v23 = vpop.f32.mrb[9].mxu1  ;;  %v5004_v47 = vpop.f32.mrb[21].mxu0  ;;  %v6404_v1 = vsel %vm6324_vm2, %v2513_v3, -1e+30 }
 0x439   :  { %v2469_v35 = vpop.f32.mrb[10].mxu1  ;;  %v2516_v21 = vpop.f32.mrb[22].mxu0  ;;  %v2659_v29 = vsel %vm2634_vm3, %v6364_v8, -inf  ;;  %v2665_v28 = vsel %vm2634_vm3, %v6404_v1, -inf }
 0x43a   :  { %v6374_v6 = vsel %vm6328_vm4, %v2469_v35, -1e+30  ;;  %v5005_v61 = vpop.f32.mrb[23].mxu0  ;;  %2660 = vmax.xlane.f32.xlu0 %v2659_v29  ;;  %v4999_v42 = vpop.f32.mrb[11].mxu1  ;;  %v6380_v36 = vsel %vm6328_vm4, %v2516_v21, -1e+30 }
 0x43b   :  { %v2662_v57 = vsel %vm2634_vm3, %v6374_v6, -inf  ;;  %v2668_v43 = vsel %vm2634_vm3, %v6380_v36, -inf }
 0x43c   :  { %2663 = vmax.xlane.f32.xlu1 %v2662_v57 }
 0x43e   :  { %2645 = vmax.xlane.f32.xlu0 %v2644_v14 }
 0x440   :  { %2669 = vmax.xlane.f32.xlu1 %v2668_v43 }
 0x442   :  { %v2560_v33 = vpop.f32.mrb[12].mxu1  ;;  %v2607_v30 = vpop.f32.mrb[24].mxu0  ;;  %2654 = vmax.xlane.f32.xlu0 %v2653_v12  ;;  %v1814_v12 = vcombine.low %v5724_v17, %v1659_v59 }
 0x443   :  { %v5016_v53 = vpop.f32.mrb[25].mxu0  ;;  %v5010_v27 = vpop.f32.mrb[13].mxu1  ;;  %v6410_v54 = vsel %vm6324_vm2, %v2560_v33, -1e+30  ;;  %v6416_v51 = vsel %vm6324_vm2, %v2607_v30, -1e+30  ;;  %v1830_v33 = vcombine.low %v1647_v55, %v1671_v18 }
 0x444   :  { %v2563_v46 = vpop.f32.mrb[14].mxu1  ;;  %v2610_v40 = vpop.f32.mrb[26].mxu0  ;;  %v2671_v7 = vsel %vm2634_vm3, %v6410_v54, -inf  ;;  %v2677_v10 = vsel %vm2634_vm3, %v6416_v51, -inf  ;;  %v1822_v30 = vrot.slane %v1814_v12, %v5818_v37 }
 0x445   :  { %v6398_v2 = vsel %vm6328_vm4, %v2563_v46, -1e+30  ;;  %v5017_v15 = vpop.f32.mrb[27].mxu0  ;;  %v5011_v31 = vpop.f32.mrb[15].mxu1  ;;  %v6424_v48 = vsel %vm6328_vm4, %v2610_v40, -1e+30  ;;  %v1838_v46 = vrot.slane %v1830_v33, %v5818_v37  ;;  %v1815_v40 = vcombine.high %v5724_v17, %v1659_v59 }
 0x446   :  { %2657 = vmax.xlane.f32.xlu0 %v2656_v24  ;;  %v2680_v11 = vsel %vm2634_vm3, %v6424_v48, -inf  ;;  %v2674_v45 = vsel %vm2634_vm3, %v6398_v2, -inf  ;;  %v1831_v15 = vcombine.high %v1647_v55, %v1671_v18 }
 0x447   :  { %v1846_v31 = vcombine.low %v1822_v30, %v1838_v46  ;;  %v1847_v24 = vcombine.high %v1822_v30, %v1838_v46 }
 0x449   :  { %v1861_v17 = vrot.slane %v1847_v24, %v5827_v50 }
 0x44a   :  { %2666 = vmax.xlane.f32.xlu0 %v2665_v28  ;;  %v1829_v28 = vrot.slane %v1815_v40, %v5818_v37 }
 0x44e   :  { %2672 = vmax.xlane.f32.xlu0 %v2671_v7  ;;  %v1845_v7 = vrot.slane %v1831_v15, %v5818_v37 }
 0x451   :  { %1672 = vrot.lane.b32.xlu1 %v5732_v19, %s5546_s3 }
 0x452   :  { %2678 = vmax.xlane.f32.xlu0 %v2677_v10  ;;  %v1854_v10 = vrot.slane %v1846_v31, %v5827_v50 }
 0x454   :  { %v2086_v55 = vcombine.low %v1854_v10, %v1861_v17  ;;  %v4738_v18 = vcombine.high %v1854_v10, %v1861_v17 }
 0x456   :  { %2681 = vmax.xlane.f32.xlu0 %v2680_v11  ;;  %v1862_v11 = vcombine.low %v1829_v28, %v1845_v7 }
 0x475   :  { %2675 = vmax.xlane.f32.xlu1 %v2674_v45  ;;  %v1863_v45 = vcombine.high %v1829_v28, %v1845_v7 }
 0x4a4   :  { %v2637_v26 = vpop.xlane.xlu0 %2636 }
 0x4a5   :  { %v2683_v13 = vsub.f32 %v6334_v4, %v2637_v26 }
 0x4a6   :  { %v2640_v62 = vpop.xlane.xlu1 %2639 }
 0x4a7   :  { %v2699_v16 = vmul.f32 1.442695, %v2683_v13  ;;  %v2684_v38 = vsub.f32 %v6340_v20, %v2640_v62 }
 0x4a8   :  { %v2649_v52 = vpop.xlane.xlu0 %2648 }
 0x4a9   :  { %5267 = vpow2.f32 %v2699_v16  ;;  %v2701_v22 = vmul.f32 1.442695, %v2684_v38  ;;  %v2687_v41 = vsub.f32 %v6346_v44, %v2649_v52  ;;  %v1870_v38 = vrot.slane %v1862_v11, %v5827_v50 }
 0x4aa   :  { %v2652_v3 = vpop.xlane.xlu1 %2651  ;;  %v1877_v52 = vrot.slane %v1863_v45, %v5827_v50 }
 0x4ab   :  { %5269 = vpow2.f32 %v2701_v22  ;;  %v2707_v23 = vmul.f32 1.442695, %v2687_v41  ;;  %v2688_v47 = vsub.f32 %v6352_v49, %v2652_v3  ;;  %v6469_v3 = vrot.slane %v2086_v55, %v5818_v37 }
 0x4ad   :  { %5271 = vpow2.f32 %v2707_v23  ;;  %v2709_v35 = vmul.f32 1.442695, %v2688_v47  ;;  %v6472_v23 = vrot.slane %v4738_v18, %v5818_v37 }
 0x4af   :  { %5273 = vpow2.f32 %v2709_v35 }
 0x4b0   :  { %v2643_v21 = vpop.xlane.xlu0 %2642 }
 0x4b1   :  { %v2685_v4 = vsub.f32 %v6358_v0, %v2643_v21  ;;  %v2102_v21 = vcombine.low %v1870_v38, %v1877_v52 }
 0x4b3   :  { %v5268_v29 = vpop.eup %5267  ;;  %v2703_v61 = vmul.f32 1.442695, %v2685_v4  ;;  %v4739_v4 = vcombine.high %v1870_v38, %v1877_v52 }
 0x4b4   :  { %v2731_v20 = vsel %vm2634_vm3, %v5268_v29, 0.0 }
 0x4b5   :  { %v5270_v42 = vpop.eup %5269  ;;  %5275 = vpow2.f32 %v2703_v61  ;;  %2732 = vadd.xlane.f32.xlu0 %v2731_v20 }
 0x4b6   :  { %v2734_v44 = vsel %vm2634_vm3, %v5270_v42, 0.0  ;;  %v2779_v57 = vpack.c.bf16 %v5270_v42, %v5268_v29  ;;  %v1883_v29 = vcombine.high %v5732_v19, %v6432_v56  ;;  %v2118_v42 = vcombine.low %v6469_v3, %v6472_v23 }
 0x4b7   :  { %v5272_v14 = vpop.eup %5271  ;;  %2735 = vadd.xlane.f32.xlu1 %v2734_v44 }
 0x4b8   :  { %5021 = vmatmul.mubr.msk.bf16.vlgmr.msra.gmra.mrb[16].mxu1 %vm2634_vm3, %v2779_v57  ;;  %v2743_v49 = vsel %vm2634_vm3, %v5272_v14, 0.0  ;;  %v6491_v30 = vrot.slane %v2118_v42, %v5827_v50 }
 0x4b9   :  { %v5274_v43 = vpop.eup %5273  ;;  %5031 = vmatpush3.bf16.msra.mxu1 %v6315_v9  ;;  %2744 = vadd.xlane.f32.xlu0 %v2743_v49  ;;  %v2109_v49 = vrot.slane %v2102_v21, %v5818_v37 }
 0x4ba   :  { %v2746_v0 = vsel %vm2634_vm3, %v5274_v43, 0.0  ;;  %5032 = vmatprep.mubr.msk.bf16.mxu1 %vm5548_vm0, %v5547_v25  ;;  %5042 = vmatprep.subr.bf16.mxu1 %v5547_v25  ;;  %v2781_v53 = vpack.c.bf16 %v5274_v43, %v5272_v14  ;;  %v2117_v43 = vrot.slane %v4739_v4, %v5818_v37 }
 0x4bb   :  { %2747 = vadd.xlane.f32.xlu1 %v2746_v0 }
 0x4bc   :  { %v2134_v7 = vcombine.low %v2109_v49, %v2117_v43 }
 0x4be   :  { %v2142_v21 = vrot.slane %v2134_v7, %v5827_v50 }
 0x4bf   :  { %v6450_v27 = vpop.eup %5275 }
 0x4c0   :  { %v2737_v9 = vsel %vm2634_vm3, %v6450_v27, 0.0  ;;  %5033 = vmatmul.mubr.msk.bf16.vlgmr.msra.gmra.mrb[20].mxu1 %vm2634_vm3, %v2781_v53 }
 0x4c1   :  { %2738 = vadd.xlane.f32.xlu0 %v2737_v9  ;;  %5044 = vmatprep.mubr.msk.bf16.mxu1 %vm5548_vm0, %v5547_v25 }
 0x4c7   :  { %v2661_v59 = vpop.xlane.xlu0 %2660 }
 0x4c8   :  { %v2691_v26 = vsub.f32 %v6364_v8, %v2661_v59  ;;  %v2135_v59 = vcombine.high %v2109_v49, %v2117_v43  ;;  %v2150_v43 = vcombine.low %v6491_v30, %v2142_v21 }
 0x4c9   :  { %v2664_v13 = vpop.xlane.xlu1 %2663 }
 0x4ca   :  { %v2715_v62 = vmul.f32 1.442695, %v2691_v26  ;;  %v2692_v16 = vsub.f32 %v6374_v6, %v2664_v13  ;;  %v1882_v6 = vcombine.low %v5732_v19, %v6432_v56  ;;  %v1897_v56 = vrot.slane %v1883_v29, %v5818_v37 }
 0x4cb   :  { %v2646_v22 = vpop.xlane.xlu0 %2645 }
 0x4cc   :  { %5277 = vpow2.f32 %v2715_v62  ;;  %v2686_v41 = vsub.f32 %v6370_v63, %v2646_v22  ;;  %v2717_v8 = vmul.f32 1.442695, %v2692_v16  ;;  %v1890_v19 = vrot.slane %v1882_v6, %v5818_v37 }
 0x4cd   :  { %v2670_v47 = vpop.xlane.xlu1 %2669  ;;  %v2149_v6 = vrot.slane %v2135_v59, %v5827_v50 }
 0x4ce   :  { %v2705_v35 = vmul.f32 1.442695, %v2686_v41  ;;  %v2694_v15 = vsub.f32 %v6380_v36, %v2670_v47  ;;  %v2119_v36 = vcombine.high %v6469_v3, %v6472_v23 }
 0x4cf   :  { %v2655_v61 = vpop.xlane.xlu0 %2654 }
 0x4d0   :  { %5279 = vpow2.f32 %v2705_v35  ;;  %v2689_v63 = vsub.f32 %v6386_v60, %v2655_v61  ;;  %v2721_v38 = vmul.f32 1.442695, %v2694_v15  ;;  %v2133_v4 = vrot.slane %v2119_v36, %v5827_v50 }
 0x4d1   :  { %5281 = vpow2.f32 %v2717_v8  ;;  %v1673_v20 = vpop.permute.xlu1 %1672 }
 0x4d2   :  { %v2711_v44 = vmul.f32 1.442695, %v2689_v63  ;;  %v1898_v57 = vcombine.low %v6430_v5, %v1673_v20  ;;  %v1899_v14 = vcombine.high %v6430_v5, %v1673_v20 }
 0x4d3   :  { %v2658_v12 = vpop.xlane.xlu0 %2657 }
 0x4d4   :  { %5283 = vpow2.f32 %v2711_v44  ;;  %v1906_v60 = vrot.slane %v1898_v57, %v5818_v37  ;;  %v1913_v0 = vrot.slane %v1899_v14, %v5818_v37  ;;  %v2690_v33 = vsub.f32 %v6394_v58, %v2658_v12 }
 0x4d6   :  { %v6493_v5 = vpop.eup %5277  ;;  %v1914_v53 = vcombine.low %v1890_v19, %v1906_v60  ;;  %v1915_v46 = vcombine.high %v1890_v19, %v1906_v60  ;;  %v1930_v40 = vcombine.low %v1897_v56, %v1913_v0  ;;  %v1931_v9 = vcombine.high %v1897_v56, %v1913_v0 }
 0x4d7   :  { %v2713_v31 = vmul.f32 1.442695, %v2690_v33  ;;  %v2667_v24 = vpop.xlane.xlu0 %2666  ;;  %v2755_v28 = vsel %vm2634_vm3, %v6493_v5, 0.0  ;;  %v2151_v60 = vcombine.high %v6491_v30, %v2142_v21  ;;  %v2152_v33 = vcombine.low %v2133_v4, %v2149_v6 }
 0x4d8   :  { %v1922_v10 = vrot.slane %v1914_v53, %v5827_v50  ;;  %v1929_v58 = vrot.slane %v1915_v46, %v5827_v50  ;;  %v1938_v17 = vrot.slane %v1930_v40, %v5827_v50  ;;  %v1945_v11 = vrot.slane %v1931_v9, %v5827_v50  ;;  %2756 = vadd.xlane.f32.xlu0 %v2755_v28 }
 0x4d9   :  { %5285 = vpow2.f32 %v2713_v31  ;;  %v2693_v45 = vsub.f32 %v6404_v1, %v2667_v24  ;;  %v2153_v9 = vcombine.high %v2133_v4, %v2149_v6 }
 0x4da   :  { %v5280_v26 = vpop.eup %5279  ;;  %v2154_v55 = vcombine.low %v1922_v10, %v1929_v58  ;;  %v4740_v18 = vcombine.high %v1922_v10, %v1929_v58  ;;  %v2170_v13 = vcombine.low %v1938_v17, %v1945_v11  ;;  %v4741_v62 = vcombine.high %v1938_v17, %v1945_v11 }
 0x4db   :  { %v6505_v16 = vpop.eup %5281  ;;  %v2719_v52 = vmul.f32 1.442695, %v2693_v45  ;;  %v2673_v22 = vpop.xlane.xlu0 %2672  ;;  %v2740_v41 = vsel %vm2634_vm3, %v5280_v26, 0.0  ;;  %v2780_v8 = vpack.c.bf16 %v5280_v26, %v6450_v27 }
 0x4dc   :  { %v2161_v1 = vrot.slane %v2154_v55, %v5818_v37  ;;  %v2169_v47 = vrot.slane %v4740_v18, %v5818_v37  ;;  %v2177_v3 = vrot.slane %v2170_v13, %v5818_v37  ;;  %v2185_v23 = vrot.slane %v4741_v62, %v5818_v37  ;;  %2741 = vadd.xlane.f32.xlu1 %v2740_v41 }
 0x4dd   :  { %v2695_v35 = vsub.f32 %v6410_v54, %v2673_v22  ;;  %5027 = vmatmul.mubr.msk.bf16.vlgmr.msra.gmra.mrb[28].mxu0 %vm2634_vm3, %v2780_v8  ;;  %v2758_v29 = vsel %vm2634_vm3, %v6505_v16, 0.0  ;;  %5287 = vpow2.f32 %v2719_v52  ;;  %v2783_v30 = vpack.c.bf16 %v6505_v16, %v6493_v5 }
 0x4de   :  { %v5284_v27 = vpop.eup %5283  ;;  %5037 = vmatpush3.bf16.msra.mxu0 %v6317_v34  ;;  %5038 = vmatprep.mubr.msk.bf16.mxu0 %vm5548_vm0, %v5547_v25  ;;  %v2186_v61 = vcombine.low %v2161_v1, %v2169_v47  ;;  %v2202_v63 = vcombine.low %v2177_v3, %v2185_v23  ;;  %v2187_v54 = vcombine.high %v2161_v1, %v2169_v47  ;;  %5289 = vpow2.f32 %v2721_v38 }
 0x4df   :  { %v2723_v20 = vmul.f32 1.442695, %v2695_v35  ;;  %v2679_v42 = vpop.xlane.xlu0 %2678  ;;  %v2749_v44 = vsel %vm2634_vm3, %v5284_v27, 0.0  ;;  %5048 = vmatprep.subr.bf16.mxu0 %v5547_v25  ;;  %v2203_v57 = vcombine.high %v2177_v3, %v2185_v23 }
 0x4e0   :  { %v2697_v34 = vsub.f32 %v6416_v51, %v2679_v42  ;;  %2759 = vadd.xlane.f32.xlu1 %v2758_v29  ;;  %2750 = vadd.xlane.f32.xlu0 %v2749_v44  ;;  %v2194_v14 = vrot.slane %v2186_v61, %v5827_v50  ;;  %v2210_v49 = vrot.slane %v2202_v63, %v5827_v50 }
 0x4e1   :  { %5291 = vpow2.f32 %v2723_v20  ;;  %v2201_v19 = vrot.slane %v2187_v54, %v5827_v50  ;;  %v2217_v56 = vrot.slane %v2203_v57, %v5827_v50 }
 0x4e2   :  { %v2218_v12 = vcombine.low %v2194_v14, %v2210_v49  ;;  %v2219_v0 = vcombine.high %v2194_v14, %v2210_v49  ;;  %v2727_v51 = vmul.f32 1.442695, %v2697_v34 }
 0x4e3   :  { %v5286_v53 = vpop.eup %5285  ;;  %v2682_v46 = vpop.xlane.xlu0 %2681  ;;  %v2220_v40 = vcombine.low %v2201_v19, %v2217_v56  ;;  %v2221_v15 = vcombine.high %v2201_v19, %v2217_v56 }
 0x4e4   :  { %v2698_v31 = vsub.f32 %v6424_v48, %v2682_v46  ;;  %v2752_v24 = vsel %vm2634_vm3, %v5286_v53, 0.0  ;;  %v2782_v28 = vpack.c.bf16 %v5286_v53, %v5284_v27  ;;  %v2226_v7 = vpack.c.bf16 %v2218_v12, %v2150_v43 }
 0x4e5   :  { %2753 = vadd.xlane.f32.xlu1 %v2752_v24  ;;  %v2227_v10 = vpack.c.bf16 %v2219_v0, %v2151_v60  ;;  %v2228_v58 = vpack.c.bf16 %v2220_v40, %v2152_v33  ;;  %v2229_v17 = vpack.c.bf16 %v2221_v15, %v2153_v9  ;;  %5293 = vpow2.f32 %v2727_v51 }
 0x4e6   :  { %v2729_v11 = vmul.f32 1.442695, %v2698_v31  ;;  %5039 = vmatmul.mubr.msk.bf16.vlgmr.msra.gmra.mrb[32].mxu0 %vm2634_vm3, %v2782_v28  ;;  %5043 = vmatpush3.bf16.msra.mxu1 %v2226_v7 }
 0x4e7   :  { %5049 = vmatpush3.bf16.msra.mxu0 %v2227_v10  ;;  %5054 = vmatprep.subr.bf16.mxu1 %v5547_v25  ;;  %v5288_v48 = vpop.eup %5287 }
 0x4e8   :  { %5295 = vpow2.f32 %v2729_v11  ;;  %5050 = vmatprep.mubr.msk.bf16.mxu0 %vm5548_vm0, %v5547_v25  ;;  %5060 = vmatprep.subr.bf16.mxu0 %v5547_v25  ;;  %v5290_v45 = vpop.eup %5289  ;;  %v2761_v5 = vsel %vm2634_vm3, %v5288_v48, 0.0 }
 0x4e9   :  { %5045 = vmatmul.mubr.msk.bf16.vlgmr.msra.gmra.mrb[24].mxu1 %vm2634_vm3, %v2783_v30  ;;  %v2784_v26 = vpack.c.bf16 %v5290_v45, %v5288_v48  ;;  %v2764_v8 = vsel %vm2634_vm3, %v5290_v45, 0.0 }
 0x4ea   :  { %5055 = vmatpush3.bf16.msra.mxu1 %v2228_v58  ;;  %5056 = vmatprep.mubr.msk.bf16.mxu1 %vm5548_vm0, %v5547_v25 }
 0x4eb   :  { %v5292_v36 = vpop.eup %5291 }
 0x4ec   :  { %v2767_v59 = vsel %vm2634_vm3, %v5292_v36, 0.0 }
 0x4ed   :  { %2768 = vadd.xlane.f32.xlu0 %v2767_v59 }
 0x4ee   :  { %5051 = vmatmul.mubr.msk.bf16.vlgmr.msra.gmra.mrb[36].mxu0 %vm2634_vm3, %v2784_v26 }
 0x4ef   :  { %5061 = vmatpush3.bf16.msra.mxu0 %v2229_v17  ;;  %5062 = vmatprep.mubr.msk.bf16.mxu0 %vm5548_vm0, %v5547_v25  ;;  %v5294_v55 = vpop.eup %5293 }
 0x4f0   :  { %v2773_v62 = vsel %vm2634_vm3, %v5294_v55, 0.0 }
 0x4f1   :  { %2762 = vadd.xlane.f32.xlu0 %v2761_v5 }
 0x4f2   :  { %v5296_v18 = vpop.eup %5295 }
 0x4f3   :  { %v2786_v13 = vpack.c.bf16 %v5296_v18, %v5294_v55  ;;  %v2776_v1 = vsel %vm2634_vm3, %v5296_v18, 0.0 }
 0x4f5   :  { %2774 = vadd.xlane.f32.xlu0 %v2773_v62 }
 0x4f6   :  { %5063 = vmatmul.mubr.msk.bf16.vlgmr.msra.gmra.mrb[40].mxu0 %vm2634_vm3, %v2786_v13 }
 0x4f7   :  { %4208 = vmatprep.mubr.bf16.mxu0 %v5544_v39 }
 0x502   :  { %v2676_v16 = vpop.xlane.xlu1 %2675 }
 0x503   :  { %v2696_v38 = vsub.f32 %v6398_v2, %v2676_v16 }
 0x505   :  { %v2725_v52 = vmul.f32 1.442695, %v2696_v38 }
 0x507   :  { %5297 = vpow2.f32 %v2725_v52 }
 0x511   :  { %v5298_v22 = vpop.eup %5297 }
 0x512   :  { %v2770_v25 = vsel %vm2634_vm3, %v5298_v22, 0.0  ;;  %v2785_v41 = vpack.c.bf16 %v5298_v22, %v5292_v36 }
 0x513   :  { %2771 = vadd.xlane.f32.xlu1 %v2770_v25 }
 0x514   :  { %5057 = vmatmul.mubr.msk.bf16.vlgmr.msra.gmra.mrb[28].mxu1 %vm2634_vm3, %v2785_v41 }
 0x517   :  { %2765 = vadd.xlane.f32.xlu1 %v2764_v8 }
 0x51b   :  { %2777 = vadd.xlane.f32.xlu1 %v2776_v1 }
 0x542   :  { %v2733_v47 = vpop.xlane.xlu0 %2732 }
 0x543   :  { %5299 = vrcp.f32 %v2733_v47 }
 0x544   :  { %v2736_v3 = vpop.xlane.xlu1 %2735 }
 0x546   :  { %v2745_v23 = vpop.xlane.xlu0 %2744 }
 0x547   :  { %5301 = vrcp.f32 %v2745_v23 }
 0x548   :  { %v2748_v2 = vpop.xlane.xlu1 %2747  ;;  %5303 = vrcp.f32 %v2736_v3 }
 0x549   :  { %5305 = vrcp.f32 %v2748_v2 }
 0x54d   :  { %v5300_v27 = vpop.eup %5299 }
 0x54e   :  { %v2739_v0 = vpop.xlane.xlu0 %2738 }
 0x54f   :  { %5307 = vrcp.f32 %v2739_v0 }
 0x551   :  { %v5302_v29 = vpop.eup %5301 }
 0x552   :  { %v5304_v63 = vpop.eup %5303 }
 0x553   :  { %v5306_v44 = vpop.eup %5305 }
 0x559   :  { %v5308_v10 = vpop.eup %5307 }
 0x565   :  { %v6557_v33 = vpop.xlane.xlu0 %2756 }
 0x569   :  { %v2742_v60 = vpop.xlane.xlu1 %2741 }
 0x56d   :  { %v6559_v53 = vpop.xlane.xlu1 %2759  ;;  %v2751_v51 = vpop.xlane.xlu0 %2750 }
 0x56e   :  { %5309 = vrcp.f32 %v2751_v51 }
 0x56f   :  { %5311 = vrcp.f32 %v2742_v60 }
 0x572   :  { %v2754_v46 = vpop.xlane.xlu1 %2753 }
 0x573   :  { %5313 = vrcp.f32 %v2754_v46 }
 0x578   :  { %v5310_v17 = vpop.eup %5309 }
 0x579   :  { %v5312_v30 = vpop.eup %5311 }
 0x57a   :  { %v6561_v40 = vpop.xlane.xlu0 %2768 }
 0x57d   :  { %v5314_v59 = vpop.eup %5313 }
 0x57e   :  { %v2763_v7 = vpop.xlane.xlu0 %2762 }
 0x57f   :  { %5315 = vrcp.f32 %v2763_v7 }
 0x582   :  { %v2775_v5 = vpop.xlane.xlu0 %2774 }
 0x58b   :  { %v2824_v35 = vpop.f32.mrb[16].mxu1 }
 0x58c   :  { %v5022_v21 = vpop.f32.mrb[17].mxu1  ;;  %v3155_v54 = vmul.f32 %v5300_v27, %v2824_v35 }
 0x58d   :  { %v2827_v4 = vpop.f32.mrb[18].mxu1 }
 0x58e   :  { %v5023_v6 = vpop.f32.mrb[19].mxu1  ;;  %v3156_v34 = vmul.f32 %v5304_v63, %v2827_v4 }
 0x593   :  { %v2912_v61 = vpop.f32.mrb[20].mxu1 }
 0x594   :  { %v3159_v20 = vmul.f32 %v5302_v29, %v2912_v61  ;;  %v5034_v42 = vpop.f32.mrb[21].mxu1 }
 0x595   :  { %v2915_v57 = vpop.f32.mrb[22].mxu1 }
 0x596   :  { %v3171_v14 = vcombine.low %v3155_v54, %v3159_v20  ;;  %v3172_v49 = vcombine.high %v3155_v54, %v3159_v20  ;;  %v3160_v43 = vmul.f32 %v5306_v44, %v2915_v57  ;;  %v5035_v19 = vpop.f32.mrb[23].mxu1 }
 0x598   :  { %v3239_v56 = vcombine.low %v3156_v34, %v3160_v43  ;;  %v3240_v12 = vcombine.high %v3156_v34, %v3160_v43  ;;  %v3179_v38 = vrot.slane %v3171_v14, %v5818_v37  ;;  %v3186_v52 = vrot.slane %v3172_v49, %v5818_v37 }
 0x59a   :  { %v3247_v23 = vrot.slane %v3239_v56, %v5818_v37  ;;  %v3254_v29 = vrot.slane %v3240_v12, %v5818_v37  ;;  %v5316_v12 = vpop.eup %5315 }
 0x5a0   :  { %v6563_v31 = vpop.xlane.xlu1 %2771 }
 0x5a4   :  { %v2766_v58 = vpop.xlane.xlu1 %2765 }
 0x5a5   :  { %5317 = vrcp.f32 %v2766_v58 }
 0x5a6   :  { %5319 = vrcp.f32 %v2775_v5 }
 0x5a8   :  { %v2778_v25 = vpop.xlane.xlu1 %2777 }
 0x5a9   :  { %5321 = vrcp.f32 %v2778_v25 }
 0x5aa   :  { %5323 = vrcp.f32 %v6557_v33 }
 0x5ab   :  { %5325 = vrcp.f32 %v6561_v40 }
 0x5ac   :  { %5327 = vrcp.f32 %v6559_v53 }
 0x5ad   :  { %5329 = vrcp.f32 %v6563_v31 }
 0x5b0   :  { %v2868_v9 = vpop.f32.mrb[28].mxu0 }
 0x5b1   :  { %v5028_v15 = vpop.f32.mrb[29].mxu0  ;;  %v3157_v48 = vmul.f32 %v5308_v10, %v2868_v9 }
 0x5b2   :  { %v2871_v24 = vpop.f32.mrb[30].mxu0  ;;  %v5318_v15 = vpop.eup %5317 }
 0x5b3   :  { %v5029_v28 = vpop.f32.mrb[31].mxu0  ;;  %v3158_v55 = vmul.f32 %v5312_v30, %v2871_v24 }
 0x5b9   :  { %v2956_v11 = vpop.f32.mrb[32].mxu0 }
 0x5ba   :  { %v3161_v45 = vmul.f32 %v5310_v17, %v2956_v11  ;;  %v5040_v36 = vpop.f32.mrb[33].mxu0 }
 0x5bb   :  { %v2959_v26 = vpop.f32.mrb[34].mxu0 }
 0x5bc   :  { %v3187_v18 = vcombine.low %v3157_v48, %v3161_v45  ;;  %v3188_v13 = vcombine.high %v3157_v48, %v3161_v45  ;;  %v3162_v62 = vmul.f32 %v5314_v59, %v2959_v26  ;;  %v5041_v16 = vpop.f32.mrb[35].mxu0  ;;  %v6567_v22 = vpop.f32.mrb[24].mxu1 }
 0x5bd   :  { %v5046_v3 = vpop.f32.mrb[25].mxu1 }
 0x5be   :  { %v3195_v41 = vrot.slane %v3187_v18, %v5818_v37  ;;  %v3202_v8 = vrot.slane %v3188_v13, %v5818_v37  ;;  %v3255_v1 = vcombine.low %v3158_v55, %v3162_v62  ;;  %v3256_v47 = vcombine.high %v3158_v55, %v3162_v62  ;;  %v6572_v2 = vpop.f32.mrb[26].mxu1  ;;  %v5320_v13 = vpop.eup %5319 }
 0x5bf   :  { %v5047_v27 = vpop.f32.mrb[27].mxu1 }
 0x5c0   :  { %v3203_v35 = vcombine.low %v3179_v38, %v3195_v41  ;;  %v3204_v21 = vcombine.high %v3179_v38, %v3195_v41  ;;  %v3219_v4 = vcombine.low %v3186_v52, %v3202_v8  ;;  %v3220_v6 = vcombine.high %v3186_v52, %v3202_v8 }
 0x5c1   :  { %v3263_v61 = vrot.slane %v3255_v1, %v5818_v37  ;;  %v3270_v63 = vrot.slane %v3256_v47, %v5818_v37  ;;  %v3044_v54 = vpop.f32.mrb[36].mxu0 }
 0x5c2   :  { %v3211_v20 = vrot.slane %v3203_v35, %v5827_v50  ;;  %v3218_v42 = vrot.slane %v3204_v21, %v5827_v50  ;;  %v3227_v44 = vrot.slane %v3219_v4, %v5827_v50  ;;  %v3234_v57 = vrot.slane %v3220_v6, %v5827_v50  ;;  %v5052_v34 = vpop.f32.mrb[37].mxu0 }
 0x5c3   :  { %v3271_v14 = vcombine.low %v3247_v23, %v3263_v61  ;;  %v3272_v49 = vcombine.high %v3247_v23, %v3263_v61  ;;  %v3287_v43 = vcombine.low %v3254_v29, %v3270_v63  ;;  %v3288_v19 = vcombine.high %v3254_v29, %v3270_v63  ;;  %v3047_v56 = vpop.f32.mrb[38].mxu0  ;;  %v5322_v23 = vpop.eup %5321 }
 0x5c4   :  { %v3443_v60 = vcombine.low %v3211_v20, %v3218_v42  ;;  %v4758_v0 = vcombine.high %v3211_v20, %v3218_v42  ;;  %v3459_v51 = vcombine.low %v3227_v44, %v3234_v57  ;;  %v4759_v46 = vcombine.high %v3227_v44, %v3234_v57  ;;  %v5053_v9 = vpop.f32.mrb[39].mxu0 }
 0x5c5   :  { %v3279_v24 = vrot.slane %v3271_v14, %v5827_v50  ;;  %v3286_v28 = vrot.slane %v3272_v49, %v5827_v50  ;;  %v3295_v7 = vrot.slane %v3287_v43, %v5827_v50  ;;  %v3302_v10 = vrot.slane %v3288_v19, %v5827_v50 }
 0x5c6   :  { %v6585_v58 = vmul.f32 %v5316_v12, %v3044_v54  ;;  %v6587_v17 = vmul.f32 %v5318_v15, %v3047_v56  ;;  %v3450_v11 = vrot.slane %v3443_v60, %v5818_v37  ;;  %v3458_v30 = vrot.slane %v4758_v0, %v5818_v37 }
 0x5c7   :  { %v3511_v48 = vcombine.low %v3279_v24, %v3286_v28  ;;  %v4760_v45 = vcombine.high %v3279_v24, %v3286_v28  ;;  %v3527_v36 = vcombine.low %v3295_v7, %v3302_v10  ;;  %v4761_v59 = vcombine.high %v3295_v7, %v3302_v10  ;;  %v5171_v7 = vld [vmem:[#allocation7] sm:$0xff]   ;;  %v5172_v10 = vld [vmem:[#allocation7 + $0x8] sm:$0xff]  }
 0x5c8   :  { %v3466_v26 = vrot.slane %v3459_v51, %v5818_v37  ;;  %v3474_v5 = vrot.slane %v4759_v46, %v5818_v37  ;;  %v3476_v55 = vcombine.high %v3450_v11, %v3458_v30  ;;  %v3475_v18 = vcombine.low %v3450_v11, %v3458_v30  ;;  %5066 = vmatprep.subr.bf16.mxu1 %v5171_v7  ;;  %v5174_v11 = vld [vmem:[#allocation7 + $0x18] sm:$0xff]   ;;  %v5175_v30 = vld [vmem:[#allocation7 + $0x20] sm:$0xff]  }
 0x5c9   :  { %v3132_v62 = vpop.f32.mrb[40].mxu0  ;;  %v3518_v16 = vrot.slane %v3511_v48, %v5818_v37  ;;  %v3526_v38 = vrot.slane %v4760_v45, %v5818_v37  ;;  %v3534_v52 = vrot.slane %v3527_v36, %v5818_v37  ;;  %v3542_v25 = vrot.slane %v4761_v59, %v5818_v37  ;;  %5067 = vmatpush3.bf16.msra.mxu1 %v5171_v7  ;;  %v5324_v48 = vpop.eup %5323 }
 0x5ca   :  { %v6597_v41 = vmul.f32 %v5320_v13, %v3132_v62  ;;  %v5064_v8 = vpop.f32.mrb[41].mxu0  ;;  %v3490_v1 = vrot.slane %v3476_v55, %v5827_v50  ;;  %v3492_v47 = vcombine.high %v3466_v26, %v3474_v5  ;;  %v6601_v3 = vrot.slane %v3475_v18, %v5827_v50  ;;  %5068 = vmatprep.subr.bf16.mxu1 %v5172_v10  ;;  %v5326_v45 = vpop.eup %5325 }
 0x5cb   :  { %v3135_v35 = vpop.f32.mrb[42].mxu0  ;;  %v3544_v21 = vcombine.high %v3518_v16, %v3526_v38  ;;  %v3560_v4 = vcombine.high %v3534_v52, %v3542_v25  ;;  %v3491_v6 = vcombine.low %v3466_v26, %v3474_v5  ;;  %v3543_v27 = vcombine.low %v3518_v16, %v3526_v38  ;;  %v5328_v59 = vpop.eup %5327 }
 0x5cc   :  { %v3323_v29 = vcombine.low %v6585_v58, %v6597_v41  ;;  %v3324_v61 = vcombine.high %v6585_v58, %v6597_v41  ;;  %v6607_v63 = vmul.f32 %v5322_v23, %v3135_v35  ;;  %v5065_v54 = vpop.f32.mrb[43].mxu0  ;;  %v3506_v20 = vrot.slane %v3492_v47, %v5827_v50  ;;  %v5330_v55 = vpop.eup %5329 }
 0x5cd   :  { %v3558_v42 = vrot.slane %v3544_v21, %v5827_v50  ;;  %v3574_v44 = vrot.slane %v3560_v4, %v5827_v50  ;;  %v6613_v57 = vrot.slane %v3491_v6, %v5827_v50  ;;  %v6620_v49 = vrot.slane %v3543_v27, %v5827_v50  ;;  %5069 = vmatpush3.bf16.msra.mxu1 %v5172_v10 }
 0x5ce   :  { %v3391_v34 = vcombine.low %v6587_v17, %v6607_v63  ;;  %v3392_v14 = vcombine.high %v6587_v17, %v6607_v63  ;;  %v3509_v43 = vcombine.low %v3490_v1, %v3506_v20  ;;  %v3559_v12 = vcombine.low %v3534_v52, %v3542_v25  ;;  %v5173_v17 = vld [vmem:[#allocation7 + $0x10] sm:$0xff]  }
 0x5cf   :  { %v3577_v19 = vcombine.low %v3558_v42, %v3574_v44  ;;  %v3508_v56 = vcombine.high %v6601_v3, %v6613_v57  ;;  %v3507_v60 = vcombine.low %v6601_v3, %v6613_v57  ;;  %v3510_v0 = vcombine.high %v3490_v1, %v3506_v20  ;;  %5070 = vmatprep.subr.bf16.mxu1 %v5173_v17 }
 0x5d0   :  { %v6627_v46 = vrot.slane %v3559_v12, %v5827_v50  ;;  %v3578_v9 = vcombine.high %v3558_v42, %v3574_v44  ;;  %v3163_v26 = vmul.f32 %v5324_v48, %v6567_v22  ;;  %v3164_v53 = vmul.f32 %v5328_v59, %v6572_v2 }
 0x5d1   :  { %v5114_v51 = vpack.i.bf16 %v3577_v19, %v3509_v43  ;;  %5071 = vmatpush3.bf16.msra.mxu1 %v5173_v17  ;;  %v3331_v16 = vrot.slane %v3323_v29, %v5818_v37  ;;  %v3338_v38 = vrot.slane %v3324_v61, %v5818_v37  ;;  %v3399_v2 = vrot.slane %v3391_v34, %v5818_v37 }
 0x5d2   :  { %v3575_v15 = vcombine.low %v6620_v49, %v6627_v46  ;;  %v3576_v24 = vcombine.high %v6620_v49, %v6627_v46  ;;  %v5119_v28 = vpack.i.bf16 %v3578_v9, %v3510_v0  ;;  %5072 = vmatprep.subr.bf16.mxu1 %v5174_v11  ;;  %v3406_v35 = vrot.slane %v3392_v14, %v5818_v37 }
 0x5d3   :  { %5115 = vrot.lane.b32.xlu1 %v5114_v51, %s5540_s0 }
 0x5d4   :  { %v5109_v58 = vpack.i.bf16 %v3576_v24, %v3508_v56 }
 0x5d5   :  { %5073 = vmatpush3.bf16.msra.mxu1 %v5174_v11 }
 0x5d6   :  { %5110 = vrot.lane.b32.xlu0 %v5109_v58, %s5546_s3  ;;  %5074 = vmatprep.subr.bf16.mxu1 %v5175_v30 }
 0x5d9   :  { %5075 = vmatpush3.bf16.msra.mxu1 %v5175_v30 }
 0x5da   :  { %5120 = vrot.lane.b32.xlu0 %v5119_v28, %s5545_s6 }
 0x5e7   :  { %v3088_v36 = vpop.f32.mrb[28].mxu1 }
 0x5e8   :  { %v3167_v5 = vmul.f32 %v5326_v45, %v3088_v36  ;;  %v5058_v33 = vpop.f32.mrb[29].mxu1  ;;  %v5176_v36 = vld [vmem:[#allocation7 + $0x28] sm:$0xff]  }
 0x5e9   :  { %v3091_v40 = vpop.f32.mrb[30].mxu1  ;;  %5076 = vmatprep.subr.bf16.mxu1 %v5176_v36 }
 0x5ea   :  { %v3307_v18 = vcombine.low %v3163_v26, %v3167_v5  ;;  %v3308_v13 = vcombine.high %v3163_v26, %v3167_v5  ;;  %v3168_v31 = vmul.f32 %v5330_v55, %v3091_v40  ;;  %v5059_v62 = vpop.f32.mrb[31].mxu1  ;;  %5077 = vmatpush3.bf16.msra.mxu1 %v5176_v36  ;;  %v4766_v36 = vld [vmem:[#allocation11 + $0x4] ss:$0 sm:$0xff] }
 0x5ec   :  { %v3315_v52 = vrot.slane %v3307_v18, %v5818_v37  ;;  %v3322_v25 = vrot.slane %v3308_v13, %v5818_v37  ;;  %v3375_v41 = vcombine.low %v3164_v53, %v3168_v31  ;;  %v3376_v22 = vcombine.high %v3164_v53, %v3168_v31 }
 0x5ee   :  { %v3339_v8 = vcombine.low %v3315_v52, %v3331_v16  ;;  %v3340_v1 = vcombine.high %v3315_v52, %v3331_v16  ;;  %v3355_v47 = vcombine.low %v3322_v25, %v3338_v38  ;;  %v3356_v23 = vcombine.high %v3322_v25, %v3338_v38 }
 0x5ef   :  { %v3383_v21 = vrot.slane %v3375_v41, %v5818_v37  ;;  %v3390_v4 = vrot.slane %v3376_v22, %v5818_v37  ;;  %v5177_v41 = vld [vmem:[#allocation7 + $0x30] sm:$0xff]  }
 0x5f0   :  { %v3347_v6 = vrot.slane %v3339_v8, %v5827_v50  ;;  %v3354_v27 = vrot.slane %v3340_v1, %v5827_v50  ;;  %v3363_v29 = vrot.slane %v3355_v47, %v5827_v50  ;;  %v3370_v61 = vrot.slane %v3356_v23, %v5827_v50  ;;  %5078 = vmatprep.subr.bf16.mxu1 %v5177_v41 }
 0x5f1   :  { %v3407_v63 = vcombine.low %v3383_v21, %v3399_v2  ;;  %v3408_v54 = vcombine.high %v3383_v21, %v3399_v2  ;;  %v3423_v20 = vcombine.low %v3390_v4, %v3406_v35  ;;  %v3424_v42 = vcombine.high %v3390_v4, %v3406_v35  ;;  %5079 = vmatpush3.bf16.msra.mxu1 %v5177_v41  ;;  %v5179_v41 = vld [vmem:[#allocation8] ss:$16 sps:$4 sm:$0xff]  }
 0x5f2   :  { %v3579_v44 = vcombine.low %v3347_v6, %v3354_v27  ;;  %v4762_v34 = vcombine.high %v3347_v6, %v3354_v27  ;;  %v3595_v43 = vcombine.low %v3363_v29, %v3370_v61  ;;  %v4763_v14 = vcombine.high %v3363_v29, %v3370_v61  ;;  %v5178_v29 = vld [vmem:[#allocation7 + $0x38] sm:$0xff]  }
 0x5f3   :  { %v3415_v19 = vrot.slane %v3407_v63, %v5827_v50  ;;  %v3422_v56 = vrot.slane %v3408_v54, %v5827_v50  ;;  %v3431_v12 = vrot.slane %v3423_v20, %v5827_v50  ;;  %v3438_v0 = vrot.slane %v3424_v42, %v5827_v50  ;;  %5080 = vmatprep.subr.bf16.mxu1 %v5178_v29 }
 0x5f4   :  { %v3586_v51 = vrot.slane %v3579_v44, %v5818_v37  ;;  %v3594_v9 = vrot.slane %v4762_v34, %v5818_v37  ;;  %v3602_v24 = vrot.slane %v3595_v43, %v5818_v37  ;;  %v3610_v28 = vrot.slane %v4763_v14, %v5818_v37 }
 0x5f5   :  { %v3647_v7 = vcombine.low %v3415_v19, %v3422_v56  ;;  %v4764_v10 = vcombine.high %v3415_v19, %v3422_v56  ;;  %v3663_v58 = vcombine.low %v3431_v12, %v3438_v0  ;;  %v4765_v17 = vcombine.high %v3431_v12, %v3438_v0  ;;  %5081 = vmatpush3.bf16.msra.mxu1 %v5178_v29 }
 0x5f6   :  { %v3611_v11 = vcombine.low %v3586_v51, %v3594_v9  ;;  %v3627_v30 = vcombine.low %v3602_v24, %v3610_v28  ;;  %v3612_v48 = vcombine.high %v3586_v51, %v3594_v9  ;;  %v3628_v45 = vcombine.high %v3602_v24, %v3610_v28 }
 0x5f7   :  { %v3654_v59 = vrot.slane %v3647_v7, %v5818_v37  ;;  %v3662_v26 = vrot.slane %v4764_v10, %v5818_v37  ;;  %v3670_v5 = vrot.slane %v3663_v58, %v5818_v37  ;;  %v3678_v33 = vrot.slane %v4765_v17, %v5818_v37 }
 0x5f8   :  { %v6667_v55 = vrot.slane %v3611_v11, %v5827_v50  ;;  %v3635_v40 = vrot.slane %v3627_v30, %v5827_v50  ;;  %v3626_v53 = vrot.slane %v3612_v48, %v5827_v50  ;;  %v3642_v18 = vrot.slane %v3628_v45, %v5827_v50 }
 0x5f9   :  { %v3679_v13 = vcombine.low %v3654_v59, %v3662_v26  ;;  %v3695_v31 = vcombine.low %v3670_v5, %v3678_v33  ;;  %v3680_v62 = vcombine.high %v3654_v59, %v3662_v26  ;;  %v3696_v16 = vcombine.high %v3670_v5, %v3678_v33 }
 0x5fa   :  { %v3644_v38 = vcombine.high %v6667_v55, %v3635_v40  ;;  %v3643_v52 = vcombine.low %v6667_v55, %v3635_v40  ;;  %v3645_v37 = vcombine.low %v3626_v53, %v3642_v18  ;;  %v3646_v25 = vcombine.high %v3626_v53, %v3642_v18  ;;  %v5339_v53 = vld [vmem:[#allocation2] sm:$0xff] }
 0x5fb   :  { %v3687_v22 = vrot.slane %v3679_v13, %v5827_v50  ;;  %v3703_v8 = vrot.slane %v3695_v31, %v5827_v50  ;;  %v3694_v1 = vrot.slane %v3680_v62, %v5827_v50  ;;  %v3710_v47 = vrot.slane %v3696_v16, %v5827_v50  ;;  %v5340_v31 = vld [vmem:[#allocation2 + $0x8] sm:$0xff]  ;;  %v5341_v16 = vld [vmem:[#allocation2 + $0x10] sm:$0xff] }
 0x5fd   :  { %v3711_v23 = vcombine.low %v3687_v22, %v3703_v8  ;;  %v3712_v2 = vcombine.high %v3687_v22, %v3703_v8  ;;  %v3713_v35 = vcombine.low %v3694_v1, %v3710_v47  ;;  %v3714_v21 = vcombine.high %v3694_v1, %v3710_v47  ;;  %v5181_v22 = vld [vmem:[#allocation8 + $0x4] ss:$16 sps:$4 sm:$0xff]   ;;  %v5182_v8 = vld [vmem:[#allocation8 + $0x8] ss:$16 sps:$4 sm:$0xff]   ;;  %v5184_v1 = vld [vmem:[#allocation8 + $0xc] ss:$16 sps:$4 sm:$0xff]  }
 0x5fe   :  { %v5187_v47 = vld [vmem:[#allocation8 + $0x24] ss:$16 sps:$4 sm:$0xff]   ;;  %4176 = vmatprep.subr.bf16.mxu0 %v5181_v22  ;;  %4229 = vmatprep.subr.bf16.mxu1 %v5184_v1 }
 0x5ff   :  { %v5124_v4 = vpack.i.bf16 %v3712_v2, %v3644_v38  ;;  %v5129_v6 = vpack.i.bf16 %v3713_v35, %v3645_v37  ;;  %v5134_v27 = vpack.i.bf16 %v3714_v21, %v3646_v25  ;;  %v5342_v37 = vld [vmem:[#allocation2 + $0x18] sm:$0xff]  ;;  %4177 = vmatpush1.bf16.msra.mxu0 %v5179_v41  ;;  %v5185_v2 = vld [vmem:[#allocation8 + $0x20] ss:$16 sps:$4 sm:$0xff]  }
 0x600   :  { %4178 = vmatprep.subr.bf16.mxu0 %v5187_v47  ;;  %v5188_v35 = vld [vmem:[#allocation8 + $0x28] ss:$16 sps:$4 sm:$0xff]  }
 0x601   :  { %5125 = vrot.lane.b32.xlu1 %v5124_v4, %s5546_s3 }
 0x603   :  { %4179 = vmatpush1.bf16.msra.mxu0 %v5185_v2 }
 0x605   :  { %5130 = vrot.lane.b32.xlu1 %v5129_v6, %s5540_s0  ;;  %s5551_s0 = smov [#allocation14]  }
 0x606   :  { %s4677_s16 = sshll.u32 %s5551_s0, 4  ;;  %s4678_s16 = int_to_ptr.vmem [resolvable:$true] %s4677_s16 }
 0x607   :  { %s5497_s17 = scalar_lea.vmem %s4678_s16, 512  ;;  %p5502_p1 = scmp.lt.s32.totalorder %s4678_s16, %s4678_s16 }
 0x608   :  { %p5498_p0 = scmp.ne.s32.totalorder %s4678_s16, %s5497_s17  ;;  %p5503_p2 = scmp.lt.s32.totalorder %s5497_s17, %s5497_s17 }
 0x609   :  { %5135 = vrot.lane.b32.xlu1 %v5134_v27, %s5545_s6 }
 0x60a   :  { %p5504_p3 = por %p5503_p2, %p5502_p1 }
 0x60c   :  { %p5505_p4 = pnand %p5504_p3, %p5498_p0 }
 0x645   :  { %v5116_v61 = vpop.permute.xlu1 %5115 }
 0x646   :  { %v5118_v20 = vunpack.i.h.bf16 %v5116_v61  ;;  %v5117_v42 = vunpack.i.l.bf16 %v5116_v61 }
 0x648   :  { %v5111_v50 = vpop.permute.xlu0 %5110 }
 0x649   :  { %v5113_v63 = vunpack.i.h.bf16 %v5111_v50  ;;  %v5112_v54 = vunpack.i.l.bf16 %v5111_v50 }
 0x64b   :  { %v3764_v44 = vsel %vm2237_vm1, %v3575_v15, %v5113_v63  ;;  %v3763_v34 = vsel %vm2237_vm1, %v3507_v60, %v5112_v54 }
 0x64c   :  { %v5121_v43 = vpop.permute.xlu0 %5120  ;;  %v3768_v56 = vsel %vm3767_vm5, %v3763_v34, %v5117_v42  ;;  %v3769_v12 = vsel %vm3767_vm5, %v3764_v44, %v5118_v20 }
 0x64d   :  { %v5123_v14 = vunpack.i.h.bf16 %v5121_v43  ;;  %v5122_v19 = vunpack.i.l.bf16 %v5121_v43 }
 0x64f   :  { %v3773_v0 = vsel %vm3772_vm6, %v3768_v56, %v5122_v19  ;;  %v3774_v49 = vsel %vm3772_vm6, %v3769_v12, %v5123_v14  ;;  %v5191_v56 = vld [vmem:[#allocation8 + $0x40] ss:$16 sps:$4 sm:$0xff]   ;;  %v5193_v12 = vld [vmem:[#allocation8 + $0x44] ss:$16 sps:$4 sm:$0xff]  }
 0x650   :  { %v3777_v46 = vpack.c.bf16 %v3774_v49, %v3773_v0  ;;  %v5194_v0 = vld [vmem:[#allocation8 + $0x48] ss:$16 sps:$4 sm:$0xff]   ;;  %v5196_v49 = vld [vmem:[#allocation8 + $0x4c] ss:$16 sps:$4 sm:$0xff]   ;;  %4180 = vmatprep.subr.bf16.mxu0 %v5193_v12 }
 0x651   :  { %4181 = vmatpush1.bf16.msra.mxu0 %v5191_v56  ;;  %v5230_v56 = vld [vmem:[#allocation10 + $0x80] sm:$0xff]   ;;  %v5231_v12 = vld [vmem:[#allocation10 + $0x48] sm:$0xff]  }
 0x652   :  { %5082 = vmatprep.mubr.bf16.mxu1 %v3777_v46  ;;  %v5199_v46 = vld [vmem:[#allocation8 + $0x64] ss:$16 sps:$4 sm:$0xff]  }
 0x653   :  { %4182 = vmatprep.subr.bf16.mxu0 %v5199_v46  ;;  %v5234_v46 = vld [vmem:[#allocation10 + $0x88] sm:$0xff]  }
 0x673   :  { %v5126_v15 = vpop.permute.xlu1 %5125 }
 0x674   :  { %v5128_v3 = vunpack.i.h.bf16 %v5126_v15  ;;  %v5127_v57 = vunpack.i.l.bf16 %v5126_v15  ;;  %v5197_v15 = vld [vmem:[#allocation8 + $0x60] ss:$16 sps:$4 sm:$0xff]  }
 0x675   :  { %4183 = vmatpush1.bf16.msra.mxu0 %v5197_v15  ;;  %v5236_v15 = vld [vmem:[#allocation10 + $0xd0] sm:$0xff]  }
 0x676   :  { %v3766_v28 = vsel %vm2237_vm1, %v3711_v23, %v5128_v3  ;;  %v3765_v7 = vsel %vm2237_vm1, %v3643_v52, %v5127_v57  ;;  %v5190_v23 = vld [vmem:[#allocation8 + $0x2c] ss:$16 sps:$4 sm:$0xff]   ;;  %v5200_v3 = vld [vmem:[#allocation8 + $0x68] ss:$16 sps:$4 sm:$0xff]   ;;  %v5205_v57 = vld [vmem:[#allocation8 + $0x84] ss:$16 sps:$4 sm:$0xff]  }
 0x677   :  { %v5131_v51 = vpop.permute.xlu1 %5130  ;;  %4184 = vmatprep.subr.bf16.mxu0 %v5205_v57  ;;  %v5237_v57 = vld [vmem:[#allocation10 + $0x10] sm:$0xff]  }
 0x678   :  { %v5133_v60 = vunpack.i.h.bf16 %v5131_v51  ;;  %v5132_v9 = vunpack.i.l.bf16 %v5131_v51  ;;  %v5202_v51 = vld [vmem:[#allocation8 + $0x6c] ss:$16 sps:$4 sm:$0xff]  }
 0x67a   :  { %v3770_v17 = vsel %vm3767_vm5, %v3765_v7, %v5132_v9  ;;  %v3771_v11 = vsel %vm3767_vm5, %v3766_v28, %v5133_v60  ;;  %v5208_v60 = vld [vmem:[#allocation8 + $0x8c] ss:$16 sps:$4 sm:$0xff]   ;;  %v5203_v9 = vld [vmem:[#allocation8 + $0x80] ss:$16 sps:$4 sm:$0xff]   ;;  %v5211_v28 = vld [vmem:[#allocation8 + $0xa4] ss:$16 sps:$4 sm:$0xff]  }
 0x67b   :  { %v5136_v24 = vpop.permute.xlu1 %5135  ;;  %v5214_v7 = vld [vmem:[#allocation8 + $0xac] ss:$16 sps:$4 sm:$0xff]   ;;  %4185 = vmatpush1.bf16.msra.mxu0 %v5203_v9 }
 0x67c   :  { %v5138_v10 = vunpack.i.h.bf16 %v5136_v24  ;;  %v5137_v58 = vunpack.i.l.bf16 %v5136_v24  ;;  %v5206_v24 = vld [vmem:[#allocation8 + $0x88] ss:$16 sps:$4 sm:$0xff]   ;;  %4186 = vmatprep.subr.bf16.mxu0 %v5211_v28 }
 0x67d   :  { %v5239_v9 = vld [vmem:[#allocation10 + $0x58] sm:$0xff]  }
 0x67e   :  { %v3775_v30 = vsel %vm3772_vm6, %v3770_v17, %v5137_v58  ;;  %v3776_v48 = vsel %vm3772_vm6, %v3771_v11, %v5138_v10  ;;  %v5209_v10 = vld [vmem:[#allocation8 + $0xa0] ss:$16 sps:$4 sm:$0xff]   ;;  %v5212_v58 = vld [vmem:[#allocation8 + $0xa8] ss:$16 sps:$4 sm:$0xff]   ;;  %v5217_v17 = vld [vmem:[#allocation8 + $0xc4] ss:$16 sps:$4 sm:$0xff]  }
 0x67f   :  { %v3778_v45 = vpack.c.bf16 %v3776_v48, %v3775_v30  ;;  %v5220_v11 = vld [vmem:[#allocation8 + $0xcc] ss:$16 sps:$4 sm:$0xff]   ;;  %4187 = vmatpush1.bf16.msra.mxu0 %v5209_v10  ;;  %v5215_v30 = vld [vmem:[#allocation8 + $0xc0] ss:$16 sps:$4 sm:$0xff]   ;;  %v5218_v48 = vld [vmem:[#allocation8 + $0xc8] ss:$16 sps:$4 sm:$0xff]  }
 0x680   :  { %4188 = vmatprep.subr.bf16.mxu0 %v5217_v17  ;;  %v5242_v28 = vld [vmem:[#allocation10 + $0x98] sm:$0xff]   ;;  %v5244_v10 = vld [vmem:[#allocation10 + $0xe0] sm:$0xff]  }
 0x681   :  { %5083 = vmatmul.mubr.bf16.vlgmr.msra.gmra.mrb[32].mxu1 %v3778_v45  ;;  %v5223_v45 = vld [vmem:[#allocation8 + $0xe4] ss:$16 sps:$4 sm:$0xff]  }
 0x682   :  { %4261 = vmatprep.mubr.bf16.mxu1 %v5544_v39  ;;  %4230 = vmatpush1.bf16.msra.mxu1 %v5182_v8  ;;  %v5246_v17 = vld [vmem:[#allocation10 + $0xa0] sm:$0xff]  }
 0x683   :  { %4231 = vmatprep.subr.bf16.mxu1 %v5190_v23  ;;  %4189 = vmatpush1.bf16.msra.mxu0 %v5215_v30  ;;  %v4775_v23 = vld [vmem:[#allocation11 + $0x2] ss:$0 sm:$0xff]  ;;  %v5248_v30 = vld [vmem:[#allocation10 + $0xe8] sm:$0xff]  }
 0x684   :  { %4190 = vmatprep.subr.bf16.mxu0 %v5223_v45  ;;  %v5250_v45 = vld [vmem:[#allocation10 + $0xa8] sm:$0xff]  }
 0x686   :  { %4232 = vmatpush1.bf16.msra.mxu1 %v5188_v35 }
 0x687   :  { %4233 = vmatprep.subr.bf16.mxu1 %v5196_v49 }
 0x68a   :  { %4234 = vmatpush1.bf16.msra.mxu1 %v5194_v0  ;;  %v5232_v0 = vld [vmem:[#allocation10 + $0xc8] sm:$0xff]  }
 0x68b   :  { %4235 = vmatprep.subr.bf16.mxu1 %v5202_v51 }
 0x68e   :  { %4236 = vmatpush1.bf16.msra.mxu1 %v5200_v3 }
 0x68f   :  { %4237 = vmatprep.subr.bf16.mxu1 %v5208_v60  ;;  %v5238_v60 = vld [vmem:[#allocation10 + $0x90] sm:$0xff]  }
 0x692   :  { %4238 = vmatpush1.bf16.msra.mxu1 %v5206_v24  ;;  %v5240_v24 = vld [vmem:[#allocation10 + $0xd8] sm:$0xff]  }
 0x693   :  { %4239 = vmatprep.subr.bf16.mxu1 %v5214_v7  ;;  %v5243_v7 = vld [vmem:[#allocation10 + $0x60] sm:$0xff]  }
 0x696   :  { %4240 = vmatpush1.bf16.msra.mxu1 %v5212_v58  ;;  %v5245_v58 = vld [vmem:[#allocation10 + $0x20] sm:$0xff]  }
 0x697   :  { %4241 = vmatprep.subr.bf16.mxu1 %v5220_v11  ;;  %v5247_v11 = vld [vmem:[#allocation10 + $0x68] sm:$0xff]  }
 0x69a   :  { %4242 = vmatpush1.bf16.msra.mxu1 %v5218_v48  ;;  %v5249_v48 = vld [vmem:[#allocation10 + $0x28] sm:$0xff]  }
 0x754   :  { %v5084_v59 = vpop.f32.mrb[32].mxu1 }
 0x755   :  { %v3881_v26 = vpop.f32.mrb[33].mxu1  ;;  %v3890_v40 = vadd.f32 %v5084_v59, %v4766_v36  ;;  %v5221_v59 = vld [vmem:[#allocation8 + $0xe0] ss:$16 sps:$4 sm:$0xff]  }
 0x756   :  { %v3882_v5 = vadd.f32 %v4766_v36, %v3881_v26  ;;  %v5085_v33 = vpop.f32.mrb[34].mxu1  ;;  %v5224_v26 = vld [vmem:[#allocation8 + $0xe8] ss:$16 sps:$4 sm:$0xff]   ;;  %4191 = vmatpush1.bf16.msra.mxu0 %v5221_v59  ;;  %v5252_v59 = vld [vmem:[#allocation10 + $0xf0] sm:$0xff]  }
 0x757   :  { %v3884_v55 = vpop.f32.mrb[35].mxu1  ;;  %v6705_v38 = vadd.f32 %v5341_v16, %v3890_v40  ;;  %v3893_v52 = vadd.f32 %v5085_v33, %v4766_v36  ;;  %v5228_v33 = vld [vmem:[#allocation10 + $0xc0] sm:$0xff]  }
 0x758   :  { %v6700_v18 = vadd.f32 %v5339_v53, %v3882_v5  ;;  %v3885_v13 = vadd.f32 %v4766_v36, %v3884_v55  ;;  %v5226_v36 = vld [vmem:[#allocation8 + $0xec] ss:$16 sps:$4 sm:$0xff]   ;;  %v5227_v5 = vld [vmem:[#allocation10 + $0x40] sm:$0xff]  }
 0x759   :  { %v6709_v25 = vadd.f32 %v5342_v37, %v3893_v52  ;;  %4243 = vmatprep.subr.bf16.mxu1 %v5226_v36  ;;  %4894 = vmatprep.subr.bf16.mxu0 %v5227_v5  ;;  %v5251_v36 = vld [vmem:[#allocation10 + $0x70] sm:$0xff]  }
 0x75a   :  { %v6702_v62 = vadd.f32 %v5340_v31, %v3885_v13  ;;  %3900 = vadd.xlane.f32.xlu0 %v6700_v18  ;;  %4244 = vmatpush1.bf16.msra.mxu1 %v5224_v26  ;;  %v5253_v26 = vld [vmem:[#allocation10 + $0x30] sm:$0xff]  }
 0x75b   :  { %4922 = vmatprep.subr.bf16.mxu1 %v5228_v33  ;;  %v5254_v5 = vld [vmem:[#allocation10 + $0xb0] sm:$0xff]   ;;  %v5255_v33 = vld [vmem:[#allocation10 + $0x78] sm:$0xff]  }
 0x75c   :  { %3902 = vadd.xlane.f32.xlu1 %v6702_v62 }
 0x75e   :  { %3904 = vadd.xlane.f32.xlu0 %v6705_v38 }
 0x762   :  { %3906 = vadd.xlane.f32.xlu0 %v6709_v25 }
 0x7e7   :  { %v3901_v21 = vpop.xlane.xlu0 %3900 }
 0x7e8   :  { %v3908_v4 = vmul.f32 0.0078125, %v3901_v21 }
 0x7e9   :  { %v3903_v6 = vpop.xlane.xlu1 %3902 }
 0x7ea   :  { %v6713_v27 = vsub.f32 %v6700_v18, %v3908_v4  ;;  %v3909_v29 = vmul.f32 0.0078125, %v3903_v6 }
 0x7eb   :  { %v3905_v61 = vpop.xlane.xlu0 %3904 }
 0x7ec   :  { %v6716_v50 = vsub.f32 %v6702_v62, %v3909_v29  ;;  %v3910_v63 = vmul.f32 0.0078125, %v3905_v61  ;;  %v3916_v54 = vmul.f32 %v6713_v27, %v6713_v27  ;;  %v4776_v29 = vld [vmem:[#allocation11 + $0x3] ss:$0 sm:$0xff] }
 0x7ee   :  { %v6721_v20 = vsub.f32 %v6705_v38, %v3910_v63  ;;  %3920 = vadd.xlane.f32.xlu0 %v3916_v54  ;;  %v3917_v42 = vmul.f32 %v6716_v50, %v6716_v50 }
 0x7ef   :  { %v3907_v44 = vpop.xlane.xlu0 %3906 }
 0x7f0   :  { %v3911_v34 = vmul.f32 0.0078125, %v3907_v44  ;;  %3922 = vadd.xlane.f32.xlu1 %v3917_v42  ;;  %v3918_v43 = vmul.f32 %v6721_v20, %v6721_v20 }
 0x7f2   :  { %v6728_v14 = vsub.f32 %v6709_v25, %v3911_v34  ;;  %3924 = vadd.xlane.f32.xlu0 %v3918_v43 }
 0x7f4   :  { %v3919_v19 = vmul.f32 %v6728_v14, %v6728_v14 }
 0x7f6   :  { %3926 = vadd.xlane.f32.xlu1 %v3919_v19  ;;  %v5229_v19 = vld [vmem:[#allocation10] sm:$0xff]  }
 0x87b   :  { %v3921_v55 = vpop.xlane.xlu0 %3920 }
 0x87c   :  { %v3928_v40 = vmul.f32 0.0078125, %v3921_v55  ;;  %v5256_v55 = vld [vmem:[#allocation10 + $0xf8] sm:$0xff]  }
 0x87d   :  { %v3923_v53 = vpop.xlane.xlu1 %3922 }
 0x87e   :  { %v3932_v13 = vadd.f32 1e-05, %v3928_v40  ;;  %v3929_v31 = vmul.f32 0.0078125, %v3923_v53  ;;  %v5257_v40 = vld [vmem:[#allocation10 + $0x38] sm:$0xff]  }
 0x87f   :  { %v3925_v16 = vpop.xlane.xlu0 %3924  ;;  %v5258_v53 = vld [vmem:[#allocation10 + $0xb8] sm:$0xff]  }
 0x880   :  { %5331 = vrsqrt.f32 %v3932_v13  ;;  %v3933_v52 = vadd.f32 1e-05, %v3929_v31  ;;  %v3930_v37 = vmul.f32 0.0078125, %v3925_v16  ;;  %v3998_v13 = vsub.s32 0, %v5813_v32  ;;  %v3994_v16 = vld [vmem:[#allocation13] sm:$0xf] }
 0x881   :  { %v4006_v31 = vsub.s32 2, %v5813_v32 }
 0x882   :  { %5333 = vrsqrt.f32 %v3933_v52  ;;  %v3934_v41 = vadd.f32 1e-05, %v3930_v37  ;;  %v4002_v52 = vsub.s32 1, %v5813_v32  ;;  %v4010_v37 = vsub.s32 3, %v5813_v32 }
 0x883   :  { %v3927_v22 = vpop.xlane.xlu1 %3926 }
 0x884   :  { %5335 = vrsqrt.f32 %v3934_v41  ;;  %v3931_v8 = vmul.f32 0.0078125, %v3927_v22  ;;  %v3999_v41 = vrot.slane %v3994_v16, %v3998_v13  ;;  %v4007_v22 = vrot.slane %v3994_v16, %v4006_v31 }
 0x886   :  { %v3935_v1 = vadd.f32 1e-05, %v3931_v8  ;;  %v4003_v8 = vrot.slane %v3994_v16, %v4002_v52 }
 0x888   :  { %5337 = vrsqrt.f32 %v3935_v1  ;;  %v4011_v1 = vrot.slane %v3994_v16, %v4010_v37 }
 0x88a   :  { %v5332_v47 = vpop.eup %5331 }
 0x88b   :  { %v3940_v2 = vmul.f32 %v5332_v47, %v6713_v27 }
 0x88c   :  { %v5334_v35 = vpop.eup %5333 }
 0x88d   :  { %v3941_v21 = vmul.f32 %v5334_v35, %v6716_v50  ;;  %v3948_v4 = vmul.f32 %v4775_v23, %v3940_v2 }
 0x88e   :  { %v5336_v6 = vpop.eup %5335 }
 0x88f   :  { %v3949_v61 = vmul.f32 %v4775_v23, %v3941_v21  ;;  %v3956_v63 = vadd.f32 %v4776_v29, %v3948_v4  ;;  %v3942_v42 = vmul.f32 %v5336_v6, %v6721_v20  ;;  %v5233_v20 = vld [vmem:[#allocation10 + $0x8] sm:$0xff]  }
 0x891   :  { %v3957_v54 = vadd.f32 %v4776_v29, %v3949_v61  ;;  %v3950_v27 = vmul.f32 %v4775_v23, %v3942_v42 }
 0x892   :  { %v5338_v44 = vpop.eup %5337 }
 0x893   :  { %v3960_v34 = vpack.c.bf16 %v3957_v54, %v3956_v63  ;;  %v3943_v43 = vmul.f32 %v5338_v44, %v6728_v14  ;;  %v5235_v14 = vld [vmem:[#allocation10 + $0x50] sm:$0xff]   ;;  %v3958_v51 = vadd.f32 %v4776_v29, %v3950_v27 }
 0x895   :  { %4209 = vmatmul.mubr.bf16.vlgmr.msra.gmra.mrb[44].mxu0 %v3960_v34  ;;  %4262 = vmatmul.mubr.bf16.vlgmr.msra.gmra.mrb[36].mxu1 %v3960_v34  ;;  %v3951_v50 = vmul.f32 %v4775_v23, %v3943_v43 }
 0x896   :  { %4218 = vmatprep.mubr.bf16.mxu0 %v5544_v39  ;;  %4271 = vmatprep.mubr.bf16.mxu1 %v5544_v39  ;;  %v5241_v39 = vld [vmem:[#allocation10 + $0x18] sm:$0xff]  }
 0x897   :  { %v3959_v49 = vadd.f32 %v4776_v29, %v3951_v50  ;;  %4895 = vmatpush3.bf16.msra.mxu0 %v5229_v19  ;;  %4923 = vmatpush3.bf16.msra.mxu1 %v5230_v56 }
 0x898   :  { %4896 = vmatprep.subr.bf16.mxu0 %v5231_v12  ;;  %4924 = vmatprep.subr.bf16.mxu1 %v5232_v0 }
 0x899   :  { %v3961_v3 = vpack.c.bf16 %v3959_v49, %v3958_v51 }
 0x89b   :  { %4897 = vmatpush3.bf16.msra.mxu0 %v5233_v20  ;;  %4925 = vmatpush3.bf16.msra.mxu1 %v5234_v46 }
 0x89c   :  { %4898 = vmatprep.subr.bf16.mxu0 %v5235_v14  ;;  %4926 = vmatprep.subr.bf16.mxu1 %v5236_v15 }
 0x89d   :  { %4219 = vmatmul.mubr.bf16.gmra.mrb[48].mxu0 %v3961_v3  ;;  %4272 = vmatmul.mubr.bf16.gmra.mrb[40].mxu1 %v3961_v3 }
 0x89f   :  { %4899 = vmatpush3.bf16.msra.mxu0 %v5237_v57  ;;  %4927 = vmatpush3.bf16.msra.mxu1 %v5238_v60 }
 0x8a0   :  { %4900 = vmatprep.subr.bf16.mxu0 %v5239_v9  ;;  %4928 = vmatprep.subr.bf16.mxu1 %v5240_v24 }
 0x8a3   :  { %4901 = vmatpush3.bf16.msra.mxu0 %v5241_v39  ;;  %4929 = vmatpush3.bf16.msra.mxu1 %v5242_v28 }
 0x8a4   :  { %4902 = vmatprep.subr.bf16.mxu0 %v5243_v7  ;;  %4930 = vmatprep.subr.bf16.mxu1 %v5244_v10 }
 0x8a7   :  { %4903 = vmatpush3.bf16.msra.mxu0 %v5245_v58  ;;  %4931 = vmatpush3.bf16.msra.mxu1 %v5246_v17 }
 0x8a8   :  { %4904 = vmatprep.subr.bf16.mxu0 %v5247_v11  ;;  %4932 = vmatprep.subr.bf16.mxu1 %v5248_v30 }
 0x8ab   :  { %4905 = vmatpush3.bf16.msra.mxu0 %v5249_v48  ;;  %4933 = vmatpush3.bf16.msra.mxu1 %v5250_v45 }
 0x8ac   :  { %4906 = vmatprep.subr.bf16.mxu0 %v5251_v36  ;;  %4934 = vmatprep.subr.bf16.mxu1 %v5252_v59 }
 0x8af   :  { %4907 = vmatpush3.bf16.msra.mxu0 %v5253_v26  ;;  %4935 = vmatpush3.bf16.msra.mxu1 %v5254_v5 }
 0x8b0   :  { %4908 = vmatprep.subr.bf16.mxu0 %v5255_v33  ;;  %4936 = vmatprep.subr.bf16.mxu1 %v5256_v55 }
 0x8b3   :  { %4909 = vmatpush3.bf16.msra.mxu0 %v5257_v40  ;;  %4937 = vmatpush3.bf16.msra.mxu1 %v5258_v53 }
 0x968   :  { %v4210_v47 = vpop.f32.mrb[44].mxu0  ;;  %v4263_v23 = vpop.f32.mrb[36].mxu1 }
 0x969   :  { %v4211_v2 = vadd.f32 %v4210_v47, %v3999_v41  ;;  %v4264_v35 = vadd.f32 %v4263_v23, %v4007_v22  ;;  %v4212_v21 = vpop.f32.mrb[45].mxu0  ;;  %v4265_v4 = vpop.f32.mrb[37].mxu1 }
 0x96a   :  { %v4213_v6 = vadd.f32 %v4212_v21, %v4003_v8  ;;  %v4266_v29 = vadd.f32 %v4265_v4, %v4011_v1  ;;  %v4214_v61 = vpop.f32.mrb[46].mxu0  ;;  %v4267_v63 = vpop.f32.mrb[38].mxu1 }
 0x96b   :  { %v4215_v54 = vadd.f32 %v4214_v61, %v3999_v41  ;;  %v4268_v42 = vadd.f32 %v4267_v63, %v4007_v22  ;;  %v4216_v44 = vpop.f32.mrb[47].mxu0  ;;  %v4269_v34 = vpop.f32.mrb[39].mxu1  ;;  %v4282_v19 = vmax.f32 %v4211_v2, 0.0  ;;  %v4284_v56 = vmax.f32 %v4264_v35, 0.0 }
 0x96c   :  { %v4217_v43 = vadd.f32 %v4216_v44, %v4003_v8  ;;  %v4270_v32 = vadd.f32 %v4269_v34, %v4011_v1  ;;  %v4283_v27 = vmax.f32 %v4213_v6, 0.0  ;;  %v4285_v50 = vmax.f32 %v4266_v29, 0.0 }
 0x96d   :  { %v4286_v12 = vmax.f32 %v4215_v54, 0.0  ;;  %v4288_v0 = vmax.f32 %v4268_v42, 0.0 }
 0x96e   :  { %v4287_v49 = vmax.f32 %v4217_v43, 0.0  ;;  %v4289_v20 = vmax.f32 %v4270_v32, 0.0 }
 0x96f   :  { %v4298_v46 = vpack.c.bf16 %v4286_v12, %v4282_v19  ;;  %v4300_v14 = vpack.c.bf16 %v4288_v0, %v4284_v56 }
 0x970   :  { %v4299_v15 = vpack.c.bf16 %v4287_v49, %v4283_v27  ;;  %v4301_v51 = vpack.c.bf16 %v4289_v20, %v4285_v50  ;;  %v4220_v3 = vpop.f32.mrb[48].mxu0  ;;  %v4273_v57 = vpop.f32.mrb[40].mxu1 }
 0x971   :  { %v4221_v60 = vadd.f32 %v4220_v3, %v3999_v41  ;;  %v4274_v9 = vadd.f32 %v4273_v57, %v4007_v22  ;;  %v4222_v24 = vpop.f32.mrb[49].mxu0  ;;  %v4275_v39 = vpop.f32.mrb[41].mxu1 }
 0x972   :  { %v4223_v28 = vadd.f32 %v4222_v24, %v4003_v8  ;;  %v4276_v7 = vadd.f32 %v4275_v39, %v4011_v1  ;;  %v4224_v10 = vpop.f32.mrb[50].mxu0  ;;  %v4277_v58 = vpop.f32.mrb[42].mxu1  ;;  %4598 = vmatprep.mubr.bf16.mxu0 %v4299_v15  ;;  %4647 = vmatprep.mubr.bf16.mxu1 %v4301_v51 }
 0x973   :  { %v4225_v17 = vadd.f32 %v4224_v10, %v3999_v41  ;;  %v4278_v11 = vadd.f32 %v4277_v58, %v4007_v22  ;;  %v4226_v30 = vpop.f32.mrb[51].mxu0  ;;  %v4279_v48 = vpop.f32.mrb[43].mxu1  ;;  %4599 = vmatmul.mubr.bf16.vlgmr.msra.gmra.mrb[52].mxu0 %v4298_v46  ;;  %4648 = vmatmul.mubr.bf16.vlgmr.msra.gmra.mrb[44].mxu1 %v4300_v14  ;;  %v4290_v59 = vmax.f32 %v4221_v60, 0.0  ;;  %v4292_v26 = vmax.f32 %v4274_v9, 0.0 }
 0x974   :  { %v4227_v45 = vadd.f32 %v4226_v30, %v4003_v8  ;;  %v4280_v36 = vadd.f32 %v4279_v48, %v4011_v1  ;;  %v4291_v55 = vmax.f32 %v4223_v28, 0.0  ;;  %v4293_v40 = vmax.f32 %v4276_v7, 0.0  ;;  %v4809_v8 = vld [vmem:[#allocation11 + $0x5] ss:$0 sm:$0xff] }
 0x975   :  { %v4294_v5 = vmax.f32 %v4225_v17, 0.0  ;;  %v4296_v33 = vmax.f32 %v4278_v11, 0.0 }
 0x976   :  { %v4295_v53 = vmax.f32 %v4227_v45, 0.0  ;;  %v4297_v13 = vmax.f32 %v4280_v36, 0.0 }
 0x977   :  { %v4302_v31 = vpack.c.bf16 %v4294_v5, %v4290_v59  ;;  %v4304_v16 = vpack.c.bf16 %v4296_v33, %v4292_v26 }
 0x978   :  { %v4303_v52 = vpack.c.bf16 %v4295_v53, %v4291_v55  ;;  %v4305_v37 = vpack.c.bf16 %v4297_v13, %v4293_v40 }
 0x97a   :  { %4606 = vmatprep.mubr.bf16.mxu0 %v4303_v52  ;;  %4655 = vmatprep.mubr.bf16.mxu1 %v4305_v37 }
 0x97b   :  { %4607 = vmatmul.mubr.bf16.gmra.mrb[56].mxu0 %v4302_v31  ;;  %4656 = vmatmul.mubr.bf16.gmra.mrb[48].mxu1 %v4304_v16 }
 0xa46   :  { %v4910_v41 = vpop.f32.mrb[52].mxu0  ;;  %v4938_v22 = vpop.f32.mrb[44].mxu1 }
 0xa47   :  { %v4911_v1 = vpop.f32.mrb[53].mxu0  ;;  %v4939_v47 = vpop.f32.mrb[45].mxu1 }
 0xa48   :  { %v4912_v23 = vadd.f32 %v4911_v1, %v4910_v41  ;;  %v4940_v2 = vadd.f32 %v4939_v47, %v4938_v22  ;;  %v4913_v35 = vpop.f32.mrb[54].mxu0  ;;  %v4941_v21 = vpop.f32.mrb[46].mxu1 }
 0xa49   :  { %v4914_v4 = vpop.f32.mrb[55].mxu0  ;;  %v4942_v6 = vpop.f32.mrb[47].mxu1 }
 0xa4a   :  { %v4601_v29 = vadd.f32 %v4912_v23, %v4809_v8  ;;  %v4915_v61 = vadd.f32 %v4914_v4, %v4913_v35  ;;  %v4943_v63 = vadd.f32 %v4942_v6, %v4941_v21 }
 0xa4c   :  { %v4650_v54 = vadd.f32 %v4940_v2, %v4601_v29  ;;  %v4604_v42 = vadd.f32 %v4915_v61, %v4809_v8 }
 0xa4e   :  { %v4664_v44 = vadd.f32 %v4650_v54, %v6700_v18  ;;  %v4653_v34 = vadd.f32 %v4943_v63, %v4604_v42  ;;  %v4916_v43 = vpop.f32.mrb[56].mxu0  ;;  %v4944_v32 = vpop.f32.mrb[48].mxu1 }
 0xa4f   :  { %v4917_v19 = vpop.f32.mrb[57].mxu0  ;;  %v4945_v56 = vpop.f32.mrb[49].mxu1 }
 0xa50   :  { %4668 = vst [vmem:[#allocation14] sm:$0xff] %v4664_v44  ;;  %v4665_v12 = vadd.f32 %v4653_v34, %v6702_v62  ;;  %v4918_v0 = vadd.f32 %v4917_v19, %v4916_v43  ;;  %v4946_v27 = vadd.f32 %v4945_v56, %v4944_v32  ;;  %v4919_v50 = vpop.f32.mrb[58].mxu0  ;;  %v4947_v49 = vpop.f32.mrb[50].mxu1 }
 0xa51   :  { %v4920_v20 = vpop.f32.mrb[59].mxu0  ;;  %v4948_v46 = vpop.f32.mrb[51].mxu1 }
 0xa52   :  { %4669 = vst [vmem:[#allocation14 + $0x8] sm:$0xff] %v4665_v12  ;;  %v4609_v14 = vadd.f32 %v4918_v0, %v4809_v8  ;;  %v4921_v15 = vadd.f32 %v4920_v20, %v4919_v50  ;;  %v4949_v51 = vadd.f32 %v4948_v46, %v4947_v49 }
 0xa54   :  { %v4658_v3 = vadd.f32 %v4946_v27, %v4609_v14  ;;  %v4612_v18 = vadd.f32 %v4921_v15, %v4809_v8 }
 0xa56   :  { %v4666_v57 = vadd.f32 %v4658_v3, %v6705_v38  ;;  %v4661_v60 = vadd.f32 %v4949_v51, %v4612_v18 }
 0xa58   :  { %4670 = vst [vmem:[#allocation14 + $0x10] sm:$0xff] %v4666_v57  ;;  %v4667_v62 = vadd.f32 %v4661_v60, %v6709_v25 }
 0xa5a   :  { %4671 = vst [vmem:[#allocation14 + $0x18] sm:$0xff] %v4667_v62 }
 0xa5b   :  { %5508 = shalt.err (!%p5505_p4)
}
 0xa5c   :  { %s5509_s20 = scalar_lea.hbm %s6768_s7, 512 }
 0xa5d   :  { %p5510_p5 = scmp.ne.s32.totalorder %s6768_s7, %s5509_s20  ;;  %p5513_p6 = scmp.lt.u32.totalorder %s5509_s20, %s6768_s7 }
 0xa5f   :  { %p5515_p7 = pnand %p5513_p6, %p5510_p5 }
 0xa61   :  { %5518 = shalt.err (!%p5515_p7)
}
 0xa62   :  { %4683 = dma.vmem_to_hbm [thread:$0]  %s4678_s16, 512, %s6768_s7, [#allocation4], %s5537_s5, %s5537_s5, %s5538_s25  }
 0xa63   :  { %5527 = dma.done.wait [#allocation4], 512  }
 0xa64   :  { %5528 = vsyncadd [#allocation4], 4294966784 }
 0xa65   :  { %4687 = vsyncpa [#allocation3], 1 }
 0xa66   :  { %4688 = vsyncpa [#allocation6], 1 }
 0xa67   :  { %4689 = vsyncpa [#allocation9], 1 }
 0xa68   :  { %4690 = vsyncpa [#allocation12], 1 }
 0xa69   :  { %4691 = vsyncpa [#allocation4], 1 }

</bundles_post_ra>
